<compile_context>
chip_gen: v5e
topology: v5e:2x2
jax: 0.10.0
libtpu: 0.0.40
codegen_flags: <defaults>
</compile_context>

<pallas_src>
import functools

import jax
import jax.numpy as jnp
from jax.experimental import pallas as pl
from jax.experimental.pallas import tpu as pltpu

PAD = 128  # lane-dense padding for all feature / hidden / output dims


def _elu(x):
    # ELU with alpha=1 (matches torch F.elu / nn.ELU defaults); f32 math.
    return jnp.where(x > 0, x, jnp.exp(jnp.minimum(x, 0.0)) - 1.0)


def _gin_model_kernel(adj_hbm_ref, pool_ref, x_ref,
                      w11_ref, b11_ref, w12_ref, b12_ref,
                      w21_ref, b21_ref, w22_ref, b22_ref,
                      w31_ref, b31_ref, w32_ref, b32_ref,
                      wm1_ref, bm1_ref, wm2_ref, bm2_ref,
                      wm3_ref, bm3_ref,
                      o_ref,
                      adj_vmem, h1_vmem, dma_sem,
                      *, tile):
    f32 = jnp.float32
    bf16 = jnp.bfloat16
    n_pad = adj_vmem.shape[0]
    n_tiles = n_pad // tile

    def adj_tile_copy(s, slot):
        row0 = pl.multiple_of(s * tile, tile)
        return pltpu.make_async_copy(
            adj_hbm_ref.at[pl.ds(row0, tile), :],
            adj_vmem.at[pl.ds(row0, tile), :],
            dma_sem.at[slot])

    # Prime the pipeline: start the DMA of the first adjacency row-tile now.
    adj_tile_copy(0, 0).start()

    def nn2(t_f32, w1_ref, b1_ref, w2_ref, b2_ref, outer_elu):
        # GINConv nn: Linear -> ELU -> Linear -> ELU (+ optional outer F.elu).
        # Matmuls are bf16-in / f32-accumulate; bias add + ELU stay f32.
        t = _elu(jnp.dot(t_f32.astype(bf16), w1_ref[...],
                         preferred_element_type=f32) + b1_ref[...])
        t = _elu(jnp.dot(t.astype(bf16), w2_ref[...],
                         preferred_element_type=f32) + b2_ref[...])
        return _elu(t) if outer_elu else t

    x_bf = x_ref[...]  # (n_pad, PAD) bf16 node features

    # ---- conv1 (+ F.elu): stream adjacency row-tiles from HBM with a manual
    # double buffer, overlapping the DMA of tile s+1 with compute on tile s.
    @pl.loop(0, n_tiles)
    def _(s):
        slot = s & 1
        adj_tile_copy(s, slot).wait()

        @pl.when(s + 1 < n_tiles)
        def _():
            adj_tile_copy(s + 1, 1 - slot).start()

        row0 = pl.multiple_of(s * tile, tile)
        # adj_hat already contains the (1 + eps) * I self term (eps = 0).
        agg = jnp.dot(adj_vmem[pl.ds(row0, tile), :], x_bf,
                      preferred_element_type=f32)
        h1 = nn2(agg, w11_ref, b11_ref, w12_ref, b12_ref, True)
        h1_vmem[pl.ds(row0, tile), :] = h1.astype(bf16)

    # ---- conv2 (+ F.elu) and conv3: adjacency is now VMEM-resident.
    adj = adj_vmem[...]
    h1 = h1_vmem[...]
    agg2 = jnp.dot(adj, h1, preferred_element_type=f32)
    h2 = nn2(agg2, w21_ref, b21_ref, w22_ref, b22_ref, True).astype(bf16)
    agg3 = jnp.dot(adj, h2, preferred_element_type=f32)
    h3 = nn2(agg3, w31_ref, b31_ref, w32_ref, b32_ref, False).astype(bf16)

    # gep: global mean pool (pool rows hold 1/|graph| weights), bf16 x bf16.
    pooled = jnp.dot(pool_ref[...], h3, preferred_element_type=f32)

    # head MLP: Linear -> ELU -> Dropout -> Linear -> ELU -> Dropout -> Linear -> ELU
    # TODO(synk): nn.Dropout is identity in eval/inference; training-mode
    # dropout (pltpu.prng_*) is not implemented.
    t = _elu(jnp.dot(pooled.astype(bf16), wm1_ref[...],
                     preferred_element_type=f32) + bm1_ref[...])
    t = _elu(jnp.dot(t.astype(bf16), wm2_ref[...],
                     preferred_element_type=f32) + bm2_ref[...])
    t = _elu(jnp.dot(t.astype(bf16), wm3_ref[...],
                     preferred_element_type=f32) + bm3_ref[...])
    o_ref[...] = t


def gin_model_forward(adj_hat_bf16, pool_bf16, x_bf16, params):
    """Fused GINModel forward.  Operands pre-padded to lane-friendly shapes."""
    n_pad = adj_hat_bf16.shape[0]
    g_pad = pool_bf16.shape[0]
    # Largest row-tile (multiple of 128) that divides n_pad.
    tile = max(t for t in (512, 256, 128) if n_pad % t == 0)

    operands = (adj_hat_bf16, pool_bf16, x_bf16) + tuple(params)
    vmem_spec = pl.BlockSpec(memory_space=pltpu.MemorySpace.VMEM)
    in_specs = [pl.BlockSpec(memory_space=pl.ANY)] + [vmem_spec] * (len(operands) - 1)

    # Generation-aware VMEM budget with headroom (v5e/v6e 128 MiB, v7x 64 MiB).
    try:
        phys_vmem = int(pltpu.get_tpu_info().vmem_capacity_bytes)
    except Exception:
        phys_vmem = 64 * 2 ** 20  # conservative fallback (v7x per-TC VMEM)
    headroom = 12 * 2 ** 20       # Mosaic internal scratch etc.
    vmem_operand_bytes = sum(int(a.size) * a.dtype.itemsize for a in operands[1:])
    scratch_bytes = 2 * n_pad * n_pad + 2 * n_pad * PAD   # bf16 adj + bf16 h1
    act_bytes = 8 * n_pad * PAD * 4                       # f32/bf16 temporaries
    needed = vmem_operand_bytes + scratch_bytes + act_bytes + 4 * 2 ** 20
    vmem_limit = int(min(phys_vmem - headroom, max(32 * 2 ** 20, needed)))

    kernel = functools.partial(_gin_model_kernel, tile=tile)
    return pl.pallas_call(
        kernel,
        out_shape=jax.ShapeDtypeStruct((g_pad, PAD), jnp.float32),
        in_specs=in_specs,
        out_specs=vmem_spec,
        scratch_shapes=[
            pltpu.VMEM((n_pad, n_pad), jnp.bfloat16),   # resident adjacency
            pltpu.VMEM((n_pad, PAD), jnp.bfloat16),     # conv1 output
            pltpu.SemaphoreType.DMA((2,)),              # double-buffer sems
        ],
        compiler_params=pltpu.CompilerParams(vmem_limit_bytes=vmem_limit),
    )(*operands)


# ----------------------------- plain-JAX glue -------------------------------

def _round_up(x, m):
    return ((x + m - 1) // m) * m


def _pad2(a, rows, cols, dtype=None):
    out = jnp.zeros((rows, cols), a.dtype if dtype is None else dtype)
    return out.at[:a.shape[0], :a.shape[1]].set(a.astype(out.dtype))


def linear_params(key, fan_in, fan_out):
    # torch.nn.Linear-style init: uniform(-1/sqrt(fan_in), 1/sqrt(fan_in)).
    # Weight stored as (in, out) so the kernel computes x @ W (== x @ W_torch.T).
    kw, kb = jax.random.split(key)
    bound = 1.0 / float(fan_in) ** 0.5
    w = jax.random.uniform(kw, (fan_in, fan_out), jnp.float32, -bound, bound)
    b = jax.random.uniform(kb, (1, fan_out), jnp.float32, -bound, bound)
    return w, b


if __name__ == "__main__":
    num_features, hidden, out_channels = 8, 16, 8
    num_graphs, nodes_per_graph = 2, 8
    num_nodes = num_graphs * nodes_per_graph

    key = jax.random.PRNGKey(0)
    keys = jax.random.split(key, 10)

    raw = [
        linear_params(keys[0], num_features, hidden),            # conv1 nn
        linear_params(keys[1], hidden, hidden),
        linear_params(keys[2], hidden, hidden * 2),               # conv2 nn
        linear_params(keys[3], hidden * 2, hidden * 2),
        linear_params(keys[4], hidden * 2, hidden),                # conv3 nn
        linear_params(keys[5], hidden, out_channels),
        linear_params(keys[6], out_channels, out_channels * 2),    # head MLP
        linear_params(keys[7], out_channels * 2, out_channels),
        linear_params(keys[8], out_channels, out_channels),
    ]

    x = jax.random.normal(keys[9], (num_nodes, num_features), jnp.float32)

    # edge_index: bidirectional ring within each of the two graphs.
    src, dst = [], []
    for g in range(num_graphs):
        for i in range(nodes_per_graph):
            a = g * nodes_per_graph + i
            b = g * nodes_per_graph + (i + 1) % nodes_per_graph
            src += [a, b]
            dst += [b, a]
    src = jnp.asarray(src, jnp.int32)
    dst = jnp.asarray(dst, jnp.int32)
    batch = jnp.repeat(jnp.arange(num_graphs, dtype=jnp.int32), nodes_per_graph)

    # Dense aggregation operator with the GIN self term folded in (eps = 0):
    # adj_hat @ h == (1 + eps) * h_i + sum_{j in N(i)} h_j.
    adj = jnp.zeros((num_nodes, num_nodes), jnp.float32).at[dst, src].add(1.0)
    adj_hat = adj + jnp.eye(num_nodes, dtype=jnp.float32)
    counts = jnp.zeros((num_graphs,), jnp.float32).at[batch].add(1.0)
    pool = (jnp.equal(jnp.arange(num_graphs)[:, None], batch[None, :])
            .astype(jnp.float32) / counts[:, None])

    # --- pad to lane/sublane-friendly shapes; matmul operands cast to bf16 ---
    n_pad = _round_up(num_nodes, 128)
    g_pad = _round_up(num_graphs, 8)
    adj_hat_p = _pad2(adj_hat, n_pad, n_pad, jnp.bfloat16)  # exact: small ints
    pool_p = _pad2(pool, g_pad, n_pad, jnp.bfloat16)
    x_p = _pad2(x, n_pad, PAD, jnp.bfloat16)
    params_p = []
    for w, b in raw:
        params_p.append(_pad2(w, PAD, PAD, jnp.bfloat16))   # weights bf16
        params_p.append(_pad2(b, 1, PAD))                   # biases f32
    params_p = tuple(params_p)

    out_p = gin_model_forward(adj_hat_p, pool_p, x_p, params_p)
    jax.block_until_ready(out_p)
    out = out_p[:num_graphs, :out_channels]

    # --- pure-JAX f32 reference (unpadded) for correctness ---
    (w11, b11), (w12, b12), (w21, b21), (w22, b22), (w31, b31), (w32, b32), \
        (wm1, bm1), (wm2, bm2), (wm3, bm3) = raw

    def ref_gin(h, w1, b1, w2, b2, outer):
        t = _elu((adj_hat @ h) @ w1 + b1)
        t = _elu(t @ w2 + b2)
        return _elu(t) if outer else t

    h = x
    h = ref_gin(h, w11, b11, w12, b12, True)
    h = ref_gin(h, w21, b21, w22, b22, True)
    h = ref_gin(h, w31, b31, w32, b32, False)
    pooled = pool @ h
    ref = _elu(_elu(_elu(pooled @ wm1 + bm1) @ wm2 + bm2) @ wm3 + bm3)

    assert out.shape == (num_graphs, out_channels)
    # Kernel uses bf16 MXU inputs (weights/activations/adjacency) with f32
    # accumulation, so it deviates slightly from the pure-f32 reference.
    assert jnp.allclose(out, ref, atol=5e-2, rtol=5e-2)
    print("KERNEL_OK")
</pallas_src>

<mosaic_0001>
module attributes {stable_mosaic.version = 11 : i64} {
  func.func @_gin_model_kernel(%arg0: memref<128x128xbf16, #tpu.memory_space<any>>, %arg1: memref<8x128xbf16, #tpu.memory_space<vmem>>, %arg2: memref<128x128xbf16, #tpu.memory_space<vmem>>, %arg3: memref<128x128xbf16, #tpu.memory_space<vmem>>, %arg4: memref<1x128xf32, #tpu.memory_space<vmem>>, %arg5: memref<128x128xbf16, #tpu.memory_space<vmem>>, %arg6: memref<1x128xf32, #tpu.memory_space<vmem>>, %arg7: memref<128x128xbf16, #tpu.memory_space<vmem>>, %arg8: memref<1x128xf32, #tpu.memory_space<vmem>>, %arg9: memref<128x128xbf16, #tpu.memory_space<vmem>>, %arg10: memref<1x128xf32, #tpu.memory_space<vmem>>, %arg11: memref<128x128xbf16, #tpu.memory_space<vmem>>, %arg12: memref<1x128xf32, #tpu.memory_space<vmem>>, %arg13: memref<128x128xbf16, #tpu.memory_space<vmem>>, %arg14: memref<1x128xf32, #tpu.memory_space<vmem>>, %arg15: memref<128x128xbf16, #tpu.memory_space<vmem>>, %arg16: memref<1x128xf32, #tpu.memory_space<vmem>>, %arg17: memref<128x128xbf16, #tpu.memory_space<vmem>>, %arg18: memref<1x128xf32, #tpu.memory_space<vmem>>, %arg19: memref<128x128xbf16, #tpu.memory_space<vmem>>, %arg20: memref<1x128xf32, #tpu.memory_space<vmem>>, %arg21: memref<8x128xf32, #tpu.memory_space<vmem>>, %arg22: memref<128x128xbf16, #tpu.memory_space<vmem>>, %arg23: memref<128x128xbf16, #tpu.memory_space<vmem>>, %arg24: memref<2x!tpu.dma_semaphore, #tpu.memory_space<semaphore_mem>>) attributes {dimension_semantics = [], scalar_prefetch = 0 : i64, scratch_operands = 3 : i64, tpu.core_type = #tpu.core_type<tc>} {
    %c0_i32 = arith.constant 0 : i32
    %0 = tpu.assume_multiple %c0_i32, 128 : i32
    %c0_i32_0 = arith.constant 0 : i32
    %c0_i32_1 = arith.constant 0 : i32
    %1 = tpu.memref_slice %arg0[%0, %c0_i32_1] : memref<128x128xbf16, #tpu.memory_space<any>> -> memref<128x128xbf16, #tpu.memory_space<any>>
    %c0_i32_2 = arith.constant 0 : i32
    %2 = tpu.memref_slice %arg22[%0, %c0_i32_2] : memref<128x128xbf16, #tpu.memory_space<vmem>> -> memref<128x128xbf16, #tpu.memory_space<vmem>>
    %3 = tpu.memref_slice %arg24[%c0_i32_0] : memref<2x!tpu.dma_semaphore, #tpu.memory_space<semaphore_mem>> -> memref<1x!tpu.dma_semaphore, #tpu.memory_space<semaphore_mem>>
    %4 = tpu.memref_squeeze %3 : memref<1x!tpu.dma_semaphore, #tpu.memory_space<semaphore_mem>> -> memref<!tpu.dma_semaphore, #tpu.memory_space<semaphore_mem>>
    tpu.enqueue_dma source(%1 : memref<128x128xbf16, #tpu.memory_space<any>>) target(%2 : memref<128x128xbf16, #tpu.memory_space<vmem>>) target_semaphore(%4 : memref<!tpu.dma_semaphore, #tpu.memory_space<semaphore_mem>>)
    %c0 = arith.constant 0 : index
    %c0_3 = arith.constant 0 : index
    %5 = vector.load %arg2[%c0, %c0_3] : memref<128x128xbf16, #tpu.memory_space<vmem>>, vector<128x128xbf16>
    %c0_i32_4 = arith.constant 0 : i32
    %c1_i32 = arith.constant 1 : i32
    %6 = arith.muli %c0_i32_4, %c1_i32 : i32
    %c0_i32_5 = arith.constant 0 : i32
    %7 = arith.addi %c0_i32_5, %6 : i32
    %c1_i32_6 = arith.constant 1 : i32
    %8 = arith.andi %7, %c1_i32_6 : i32
    %c128_i32 = arith.constant 128 : i32
    %9 = arith.muli %7, %c128_i32 : i32
    %10 = tpu.assume_multiple %9, 128 : i32
    %c0_i32_7 = arith.constant 0 : i32
    %11 = tpu.memref_slice %arg0[%10, %c0_i32_7] : memref<128x128xbf16, #tpu.memory_space<any>> -> memref<128x128xbf16, #tpu.memory_space<any>>
    %c0_i32_8 = arith.constant 0 : i32
    %12 = tpu.memref_slice %arg22[%10, %c0_i32_8] : memref<128x128xbf16, #tpu.memory_space<vmem>> -> memref<128x128xbf16, #tpu.memory_space<vmem>>
    %13 = tpu.memref_slice %arg24[%8] : memref<2x!tpu.dma_semaphore, #tpu.memory_space<semaphore_mem>> -> memref<1x!tpu.dma_semaphore, #tpu.memory_space<semaphore_mem>>
    %14 = tpu.memref_squeeze %13 : memref<1x!tpu.dma_semaphore, #tpu.memory_space<semaphore_mem>> -> memref<!tpu.dma_semaphore, #tpu.memory_space<semaphore_mem>>
    tpu.wait_dma2 semaphore(%14 : memref<!tpu.dma_semaphore, #tpu.memory_space<semaphore_mem>>) src(%11 : memref<128x128xbf16, #tpu.memory_space<any>>) dst(%12 : memref<128x128xbf16, #tpu.memory_space<vmem>>)
    %c1_i32_9 = arith.constant 1 : i32
    %15 = arith.addi %7, %c1_i32_9 : i32
    %c1_i32_10 = arith.constant 1 : i32
    %16 = arith.cmpi slt, %15, %c1_i32_10 : i32
    %17 = arith.extui %16 : i1 to i32
    %c0_i32_11 = arith.constant 0 : i32
    %18 = arith.cmpi ne, %17, %c0_i32_11 : i32
    scf.if %18 {
      %c1_i32_105 = arith.constant 1 : i32
      %178 = arith.addi %7, %c1_i32_105 : i32
      %c1_i32_106 = arith.constant 1 : i32
      %179 = arith.subi %c1_i32_106, %8 : i32
      %c128_i32_107 = arith.constant 128 : i32
      %180 = arith.muli %178, %c128_i32_107 : i32
      %181 = tpu.assume_multiple %180, 128 : i32
      %c0_i32_108 = arith.constant 0 : i32
      %182 = tpu.memref_slice %arg0[%181, %c0_i32_108] : memref<128x128xbf16, #tpu.memory_space<any>> -> memref<128x128xbf16, #tpu.memory_space<any>>
      %c0_i32_109 = arith.constant 0 : i32
      %183 = tpu.memref_slice %arg22[%181, %c0_i32_109] : memref<128x128xbf16, #tpu.memory_space<vmem>> -> memref<128x128xbf16, #tpu.memory_space<vmem>>
      %184 = tpu.memref_slice %arg24[%179] : memref<2x!tpu.dma_semaphore, #tpu.memory_space<semaphore_mem>> -> memref<1x!tpu.dma_semaphore, #tpu.memory_space<semaphore_mem>>
      %185 = tpu.memref_squeeze %184 : memref<1x!tpu.dma_semaphore, #tpu.memory_space<semaphore_mem>> -> memref<!tpu.dma_semaphore, #tpu.memory_space<semaphore_mem>>
      tpu.enqueue_dma source(%182 : memref<128x128xbf16, #tpu.memory_space<any>>) target(%183 : memref<128x128xbf16, #tpu.memory_space<vmem>>) target_semaphore(%185 : memref<!tpu.dma_semaphore, #tpu.memory_space<semaphore_mem>>)
    } else {
    }
    %c128_i32_12 = arith.constant 128 : i32
    %19 = arith.muli %7, %c128_i32_12 : i32
    %20 = tpu.assume_multiple %19, 128 : i32
    %21 = arith.index_cast %20 : i32 to index
    %c0_13 = arith.constant 0 : index
    %22 = vector.load %arg22[%21, %c0_13] : memref<128x128xbf16, #tpu.memory_space<vmem>>, vector<128x128xbf16>
    %cst = arith.constant dense<0.000000e+00> : vector<128x128xf32>
    %23 = tpu.matmul %22, %5, %cst {dimension_numbers = #tpu.dot_dimension_numbers<[1], [0], [0], [1], [0, 0, 1, 1], [], []>} : vector<128x128xbf16>, vector<128x128xbf16>, vector<128x128xf32> -> vector<128x128xf32>
    %24 = arith.truncf %23 : vector<128x128xf32> to vector<128x128xbf16>
    %c0_14 = arith.constant 0 : index
    %c0_15 = arith.constant 0 : index
    %25 = vector.load %arg3[%c0_14, %c0_15] : memref<128x128xbf16, #tpu.memory_space<vmem>>, vector<128x128xbf16>
    %cst_16 = arith.constant dense<0.000000e+00> : vector<128x128xf32>
    %26 = tpu.matmul %24, %25, %cst_16 {dimension_numbers = #tpu.dot_dimension_numbers<[1], [0], [0], [1], [0, 0, 1, 1], [], []>} : vector<128x128xbf16>, vector<128x128xbf16>, vector<128x128xf32> -> vector<128x128xf32>
    %c0_17 = arith.constant 0 : index
    %c0_18 = arith.constant 0 : index
    %27 = vector.load %arg4[%c0_17, %c0_18] : memref<1x128xf32, #tpu.memory_space<vmem>>, vector<1x128xf32>
    %28 = vector.broadcast %27 : vector<1x128xf32> to vector<128x128xf32>
    %29 = arith.addf %26, %28 : vector<128x128xf32>
    %cst_19 = arith.constant 0.000000e+00 : f32
    %30 = vector.broadcast %cst_19 : f32 to vector<128x128xf32>
    %31 = arith.cmpf ogt, %29, %30 : vector<128x128xf32>
    %cst_20 = arith.constant 0.000000e+00 : f32
    %32 = vector.broadcast %cst_20 : f32 to vector<128x128xf32>
    %33 = arith.minimumf %29, %32 : vector<128x128xf32>
    %34 = math.exp %33 : vector<128x128xf32>
    %cst_21 = arith.constant 1.000000e+00 : f32
    %35 = vector.broadcast %cst_21 : f32 to vector<128x128xf32>
    %36 = arith.subf %34, %35 : vector<128x128xf32>
    %37 = arith.select %31, %29, %36 : vector<128x128xi1>, vector<128x128xf32>
    %38 = arith.truncf %37 : vector<128x128xf32> to vector<128x128xbf16>
    %c0_22 = arith.constant 0 : index
    %c0_23 = arith.constant 0 : index
    %39 = vector.load %arg5[%c0_22, %c0_23] : memref<128x128xbf16, #tpu.memory_space<vmem>>, vector<128x128xbf16>
    %cst_24 = arith.constant dense<0.000000e+00> : vector<128x128xf32>
    %40 = tpu.matmul %38, %39, %cst_24 {dimension_numbers = #tpu.dot_dimension_numbers<[1], [0], [0], [1], [0, 0, 1, 1], [], []>} : vector<128x128xbf16>, vector<128x128xbf16>, vector<128x128xf32> -> vector<128x128xf32>
    %c0_25 = arith.constant 0 : index
    %c0_26 = arith.constant 0 : index
    %41 = vector.load %arg6[%c0_25, %c0_26] : memref<1x128xf32, #tpu.memory_space<vmem>>, vector<1x128xf32>
    %42 = vector.broadcast %41 : vector<1x128xf32> to vector<128x128xf32>
    %43 = arith.addf %40, %42 : vector<128x128xf32>
    %cst_27 = arith.constant 0.000000e+00 : f32
    %44 = vector.broadcast %cst_27 : f32 to vector<128x128xf32>
    %45 = arith.cmpf ogt, %43, %44 : vector<128x128xf32>
    %cst_28 = arith.constant 0.000000e+00 : f32
    %46 = vector.broadcast %cst_28 : f32 to vector<128x128xf32>
    %47 = arith.minimumf %43, %46 : vector<128x128xf32>
    %48 = math.exp %47 : vector<128x128xf32>
    %cst_29 = arith.constant 1.000000e+00 : f32
    %49 = vector.broadcast %cst_29 : f32 to vector<128x128xf32>
    %50 = arith.subf %48, %49 : vector<128x128xf32>
    %51 = arith.select %45, %43, %50 : vector<128x128xi1>, vector<128x128xf32>
    %cst_30 = arith.constant 0.000000e+00 : f32
    %52 = vector.broadcast %cst_30 : f32 to vector<128x128xf32>
    %53 = arith.cmpf ogt, %51, %52 : vector<128x128xf32>
    %cst_31 = arith.constant 0.000000e+00 : f32
    %54 = vector.broadcast %cst_31 : f32 to vector<128x128xf32>
    %55 = arith.minimumf %51, %54 : vector<128x128xf32>
    %56 = math.exp %55 : vector<128x128xf32>
    %cst_32 = arith.constant 1.000000e+00 : f32
    %57 = vector.broadcast %cst_32 : f32 to vector<128x128xf32>
    %58 = arith.subf %56, %57 : vector<128x128xf32>
    %59 = arith.select %53, %51, %58 : vector<128x128xi1>, vector<128x128xf32>
    %60 = arith.truncf %59 : vector<128x128xf32> to vector<128x128xbf16>
    %61 = arith.index_cast %20 : i32 to index
    %c0_33 = arith.constant 0 : index
    %62 = vector.load %arg23[%61, %c0_33] : memref<128x128xbf16, #tpu.memory_space<vmem>>, vector<128x128xbf16>
    tpu.vector_store %arg23[%61, %c0_33], %60 {strides = array<i32>} : memref<128x128xbf16, #tpu.memory_space<vmem>>, vector<128x128xbf16>,
    %c1_i32_34 = arith.constant 1 : i32
    %c0_35 = arith.constant 0 : index
    %c0_36 = arith.constant 0 : index
    %63 = vector.load %arg22[%c0_35, %c0_36] : memref<128x128xbf16, #tpu.memory_space<vmem>>, vector<128x128xbf16>
    %c0_37 = arith.constant 0 : index
    %c0_38 = arith.constant 0 : index
    %64 = vector.load %arg23[%c0_37, %c0_38] : memref<128x128xbf16, #tpu.memory_space<vmem>>, vector<128x128xbf16>
    %cst_39 = arith.constant dense<0.000000e+00> : vector<128x128xf32>
    %65 = tpu.matmul %63, %64, %cst_39 {dimension_numbers = #tpu.dot_dimension_numbers<[1], [0], [0], [1], [0, 0, 1, 1], [], []>} : vector<128x128xbf16>, vector<128x128xbf16>, vector<128x128xf32> -> vector<128x128xf32>
    %66 = arith.truncf %65 : vector<128x128xf32> to vector<128x128xbf16>
    %c0_40 = arith.constant 0 : index
    %c0_41 = arith.constant 0 : index
    %67 = vector.load %arg7[%c0_40, %c0_41] : memref<128x128xbf16, #tpu.memory_space<vmem>>, vector<128x128xbf16>
    %cst_42 = arith.constant dense<0.000000e+00> : vector<128x128xf32>
    %68 = tpu.matmul %66, %67, %cst_42 {dimension_numbers = #tpu.dot_dimension_numbers<[1], [0], [0], [1], [0, 0, 1, 1], [], []>} : vector<128x128xbf16>, vector<128x128xbf16>, vector<128x128xf32> -> vector<128x128xf32>
    %c0_43 = arith.constant 0 : index
    %c0_44 = arith.constant 0 : index
    %69 = vector.load %arg8[%c0_43, %c0_44] : memref<1x128xf32, #tpu.memory_space<vmem>>, vector<1x128xf32>
    %70 = vector.broadcast %69 : vector<1x128xf32> to vector<128x128xf32>
    %71 = arith.addf %68, %70 : vector<128x128xf32>
    %cst_45 = arith.constant 0.000000e+00 : f32
    %72 = vector.broadcast %cst_45 : f32 to vector<128x128xf32>
    %73 = arith.cmpf ogt, %71, %72 : vector<128x128xf32>
    %cst_46 = arith.constant 0.000000e+00 : f32
    %74 = vector.broadcast %cst_46 : f32 to vector<128x128xf32>
    %75 = arith.minimumf %71, %74 : vector<128x128xf32>
    %76 = math.exp %75 : vector<128x128xf32>
    %cst_47 = arith.constant 1.000000e+00 : f32
    %77 = vector.broadcast %cst_47 : f32 to vector<128x128xf32>
    %78 = arith.subf %76, %77 : vector<128x128xf32>
    %79 = arith.select %73, %71, %78 : vector<128x128xi1>, vector<128x128xf32>
    %80 = arith.truncf %79 : vector<128x128xf32> to vector<128x128xbf16>
    %c0_48 = arith.constant 0 : index
    %c0_49 = arith.constant 0 : index
    %81 = vector.load %arg9[%c0_48, %c0_49] : memref<128x128xbf16, #tpu.memory_space<vmem>>, vector<128x128xbf16>
    %cst_50 = arith.constant dense<0.000000e+00> : vector<128x128xf32>
    %82 = tpu.matmul %80, %81, %cst_50 {dimension_numbers = #tpu.dot_dimension_numbers<[1], [0], [0], [1], [0, 0, 1, 1], [], []>} : vector<128x128xbf16>, vector<128x128xbf16>, vector<128x128xf32> -> vector<128x128xf32>
    %c0_51 = arith.constant 0 : index
    %c0_52 = arith.constant 0 : index
    %83 = vector.load %arg10[%c0_51, %c0_52] : memref<1x128xf32, #tpu.memory_space<vmem>>, vector<1x128xf32>
    %84 = vector.broadcast %83 : vector<1x128xf32> to vector<128x128xf32>
    %85 = arith.addf %82, %84 : vector<128x128xf32>
    %cst_53 = arith.constant 0.000000e+00 : f32
    %86 = vector.broadcast %cst_53 : f32 to vector<128x128xf32>
    %87 = arith.cmpf ogt, %85, %86 : vector<128x128xf32>
    %cst_54 = arith.constant 0.000000e+00 : f32
    %88 = vector.broadcast %cst_54 : f32 to vector<128x128xf32>
    %89 = arith.minimumf %85, %88 : vector<128x128xf32>
    %90 = math.exp %89 : vector<128x128xf32>
    %cst_55 = arith.constant 1.000000e+00 : f32
    %91 = vector.broadcast %cst_55 : f32 to vector<128x128xf32>
    %92 = arith.subf %90, %91 : vector<128x128xf32>
    %93 = arith.select %87, %85, %92 : vector<128x128xi1>, vector<128x128xf32>
    %cst_56 = arith.constant 0.000000e+00 : f32
    %94 = vector.broadcast %cst_56 : f32 to vector<128x128xf32>
    %95 = arith.cmpf ogt, %93, %94 : vector<128x128xf32>
    %cst_57 = arith.constant 0.000000e+00 : f32
    %96 = vector.broadcast %cst_57 : f32 to vector<128x128xf32>
    %97 = arith.minimumf %93, %96 : vector<128x128xf32>
    %98 = math.exp %97 : vector<128x128xf32>
    %cst_58 = arith.constant 1.000000e+00 : f32
    %99 = vector.broadcast %cst_58 : f32 to vector<128x128xf32>
    %100 = arith.subf %98, %99 : vector<128x128xf32>
    %101 = arith.select %95, %93, %100 : vector<128x128xi1>, vector<128x128xf32>
    %102 = arith.truncf %101 : vector<128x128xf32> to vector<128x128xbf16>
    %cst_59 = arith.constant dense<0.000000e+00> : vector<128x128xf32>
    %103 = tpu.matmul %63, %102, %cst_59 {dimension_numbers = #tpu.dot_dimension_numbers<[1], [0], [0], [1], [0, 0, 1, 1], [], []>} : vector<128x128xbf16>, vector<128x128xbf16>, vector<128x128xf32> -> vector<128x128xf32>
    %104 = arith.truncf %103 : vector<128x128xf32> to vector<128x128xbf16>
    %c0_60 = arith.constant 0 : index
    %c0_61 = arith.constant 0 : index
    %105 = vector.load %arg11[%c0_60, %c0_61] : memref<128x128xbf16, #tpu.memory_space<vmem>>, vector<128x128xbf16>
    %cst_62 = arith.constant dense<0.000000e+00> : vector<128x128xf32>
    %106 = tpu.matmul %104, %105, %cst_62 {dimension_numbers = #tpu.dot_dimension_numbers<[1], [0], [0], [1], [0, 0, 1, 1], [], []>} : vector<128x128xbf16>, vector<128x128xbf16>, vector<128x128xf32> -> vector<128x128xf32>
    %c0_63 = arith.constant 0 : index
    %c0_64 = arith.constant 0 : index
    %107 = vector.load %arg12[%c0_63, %c0_64] : memref<1x128xf32, #tpu.memory_space<vmem>>, vector<1x128xf32>
    %108 = vector.broadcast %107 : vector<1x128xf32> to vector<128x128xf32>
    %109 = arith.addf %106, %108 : vector<128x128xf32>
    %cst_65 = arith.constant 0.000000e+00 : f32
    %110 = vector.broadcast %cst_65 : f32 to vector<128x128xf32>
    %111 = arith.cmpf ogt, %109, %110 : vector<128x128xf32>
    %cst_66 = arith.constant 0.000000e+00 : f32
    %112 = vector.broadcast %cst_66 : f32 to vector<128x128xf32>
    %113 = arith.minimumf %109, %112 : vector<128x128xf32>
    %114 = math.exp %113 : vector<128x128xf32>
    %cst_67 = arith.constant 1.000000e+00 : f32
    %115 = vector.broadcast %cst_67 : f32 to vector<128x128xf32>
    %116 = arith.subf %114, %115 : vector<128x128xf32>
    %117 = arith.select %111, %109, %116 : vector<128x128xi1>, vector<128x128xf32>
    %118 = arith.truncf %117 : vector<128x128xf32> to vector<128x128xbf16>
    %c0_68 = arith.constant 0 : index
    %c0_69 = arith.constant 0 : index
    %119 = vector.load %arg13[%c0_68, %c0_69] : memref<128x128xbf16, #tpu.memory_space<vmem>>, vector<128x128xbf16>
    %cst_70 = arith.constant dense<0.000000e+00> : vector<128x128xf32>
    %120 = tpu.matmul %118, %119, %cst_70 {dimension_numbers = #tpu.dot_dimension_numbers<[1], [0], [0], [1], [0, 0, 1, 1], [], []>} : vector<128x128xbf16>, vector<128x128xbf16>, vector<128x128xf32> -> vector<128x128xf32>
    %c0_71 = arith.constant 0 : index
    %c0_72 = arith.constant 0 : index
    %121 = vector.load %arg14[%c0_71, %c0_72] : memref<1x128xf32, #tpu.memory_space<vmem>>, vector<1x128xf32>
    %122 = vector.broadcast %121 : vector<1x128xf32> to vector<128x128xf32>
    %123 = arith.addf %120, %122 : vector<128x128xf32>
    %cst_73 = arith.constant 0.000000e+00 : f32
    %124 = vector.broadcast %cst_73 : f32 to vector<128x128xf32>
    %125 = arith.cmpf ogt, %123, %124 : vector<128x128xf32>
    %cst_74 = arith.constant 0.000000e+00 : f32
    %126 = vector.broadcast %cst_74 : f32 to vector<128x128xf32>
    %127 = arith.minimumf %123, %126 : vector<128x128xf32>
    %128 = math.exp %127 : vector<128x128xf32>
    %cst_75 = arith.constant 1.000000e+00 : f32
    %129 = vector.broadcast %cst_75 : f32 to vector<128x128xf32>
    %130 = arith.subf %128, %129 : vector<128x128xf32>
    %131 = arith.select %125, %123, %130 : vector<128x128xi1>, vector<128x128xf32>
    %132 = arith.truncf %131 : vector<128x128xf32> to vector<128x128xbf16>
    %c0_76 = arith.constant 0 : index
    %c0_77 = arith.constant 0 : index
    %133 = vector.load %arg1[%c0_76, %c0_77] : memref<8x128xbf16, #tpu.memory_space<vmem>>, vector<8x128xbf16>
    %cst_78 = arith.constant dense<0.000000e+00> : vector<8x128xf32>
    %134 = tpu.matmul %133, %132, %cst_78 {dimension_numbers = #tpu.dot_dimension_numbers<[1], [0], [0], [1], [0, 0, 1, 1], [], []>} : vector<8x128xbf16>, vector<128x128xbf16>, vector<8x128xf32> -> vector<8x128xf32>
    %135 = arith.truncf %134 : vector<8x128xf32> to vector<8x128xbf16>
    %c0_79 = arith.constant 0 : index
    %c0_80 = arith.constant 0 : index
    %136 = vector.load %arg15[%c0_79, %c0_80] : memref<128x128xbf16, #tpu.memory_space<vmem>>, vector<128x128xbf16>
    %cst_81 = arith.constant dense<0.000000e+00> : vector<8x128xf32>
    %137 = tpu.matmul %135, %136, %cst_81 {dimension_numbers = #tpu.dot_dimension_numbers<[1], [0], [0], [1], [0, 0, 1, 1], [], []>} : vector<8x128xbf16>, vector<128x128xbf16>, vector<8x128xf32> -> vector<8x128xf32>
    %c0_82 = arith.constant 0 : index
    %c0_83 = arith.constant 0 : index
    %138 = vector.load %arg16[%c0_82, %c0_83] : memref<1x128xf32, #tpu.memory_space<vmem>>, vector<1x128xf32>
    %139 = vector.broadcast %138 : vector<1x128xf32> to vector<8x128xf32>
    %140 = arith.addf %137, %139 : vector<8x128xf32>
    %cst_84 = arith.constant 0.000000e+00 : f32
    %141 = vector.broadcast %cst_84 : f32 to vector<8x128xf32>
    %142 = arith.cmpf ogt, %140, %141 : vector<8x128xf32>
    %cst_85 = arith.constant 0.000000e+00 : f32
    %143 = vector.broadcast %cst_85 : f32 to vector<8x128xf32>
    %144 = arith.minimumf %140, %143 : vector<8x128xf32>
    %145 = math.exp %144 : vector<8x128xf32>
    %cst_86 = arith.constant 1.000000e+00 : f32
    %146 = vector.broadcast %cst_86 : f32 to vector<8x128xf32>
    %147 = arith.subf %145, %146 : vector<8x128xf32>
    %148 = arith.select %142, %140, %147 : vector<8x128xi1>, vector<8x128xf32>
    %149 = arith.truncf %148 : vector<8x128xf32> to vector<8x128xbf16>
    %c0_87 = arith.constant 0 : index
    %c0_88 = arith.constant 0 : index
    %150 = vector.load %arg17[%c0_87, %c0_88] : memref<128x128xbf16, #tpu.memory_space<vmem>>, vector<128x128xbf16>
    %cst_89 = arith.constant dense<0.000000e+00> : vector<8x128xf32>
    %151 = tpu.matmul %149, %150, %cst_89 {dimension_numbers = #tpu.dot_dimension_numbers<[1], [0], [0], [1], [0, 0, 1, 1], [], []>} : vector<8x128xbf16>, vector<128x128xbf16>, vector<8x128xf32> -> vector<8x128xf32>
    %c0_90 = arith.constant 0 : index
    %c0_91 = arith.constant 0 : index
    %152 = vector.load %arg18[%c0_90, %c0_91] : memref<1x128xf32, #tpu.memory_space<vmem>>, vector<1x128xf32>
    %153 = vector.broadcast %152 : vector<1x128xf32> to vector<8x128xf32>
    %154 = arith.addf %151, %153 : vector<8x128xf32>
    %cst_92 = arith.constant 0.000000e+00 : f32
    %155 = vector.broadcast %cst_92 : f32 to vector<8x128xf32>
    %156 = arith.cmpf ogt, %154, %155 : vector<8x128xf32>
    %cst_93 = arith.constant 0.000000e+00 : f32
    %157 = vector.broadcast %cst_93 : f32 to vector<8x128xf32>
    %158 = arith.minimumf %154, %157 : vector<8x128xf32>
    %159 = math.exp %158 : vector<8x128xf32>
    %cst_94 = arith.constant 1.000000e+00 : f32
    %160 = vector.broadcast %cst_94 : f32 to vector<8x128xf32>
    %161 = arith.subf %159, %160 : vector<8x128xf32>
    %162 = arith.select %156, %154, %161 : vector<8x128xi1>, vector<8x128xf32>
    %163 = arith.truncf %162 : vector<8x128xf32> to vector<8x128xbf16>
    %c0_95 = arith.constant 0 : index
    %c0_96 = arith.constant 0 : index
    %164 = vector.load %arg19[%c0_95, %c0_96] : memref<128x128xbf16, #tpu.memory_space<vmem>>, vector<128x128xbf16>
    %cst_97 = arith.constant dense<0.000000e+00> : vector<8x128xf32>
    %165 = tpu.matmul %163, %164, %cst_97 {dimension_numbers = #tpu.dot_dimension_numbers<[1], [0], [0], [1], [0, 0, 1, 1], [], []>} : vector<8x128xbf16>, vector<128x128xbf16>, vector<8x128xf32> -> vector<8x128xf32>
    %c0_98 = arith.constant 0 : index
    %c0_99 = arith.constant 0 : index
    %166 = vector.load %arg20[%c0_98, %c0_99] : memref<1x128xf32, #tpu.memory_space<vmem>>, vector<1x128xf32>
    %167 = vector.broadcast %166 : vector<1x128xf32> to vector<8x128xf32>
    %168 = arith.addf %165, %167 : vector<8x128xf32>
    %cst_100 = arith.constant 0.000000e+00 : f32
    %169 = vector.broadcast %cst_100 : f32 to vector<8x128xf32>
    %170 = arith.cmpf ogt, %168, %169 : vector<8x128xf32>
    %cst_101 = arith.constant 0.000000e+00 : f32
    %171 = vector.broadcast %cst_101 : f32 to vector<8x128xf32>
    %172 = arith.minimumf %168, %171 : vector<8x128xf32>
    %173 = math.exp %172 : vector<8x128xf32>
    %cst_102 = arith.constant 1.000000e+00 : f32
    %174 = vector.broadcast %cst_102 : f32 to vector<8x128xf32>
    %175 = arith.subf %173, %174 : vector<8x128xf32>
    %176 = arith.select %170, %168, %175 : vector<8x128xi1>, vector<8x128xf32>
    %c0_103 = arith.constant 0 : index
    %c0_104 = arith.constant 0 : index
    %177 = vector.load %arg21[%c0_103, %c0_104] : memref<8x128xf32, #tpu.memory_space<vmem>>, vector<8x128xf32>
    tpu.vector_store %arg21[%c0_103, %c0_104], %176 {strides = array<i32>} : memref<8x128xf32, #tpu.memory_space<vmem>>, vector<8x128xf32>,
    return
  }
}

</mosaic_0001>

<bundles_post_ra>
// kernel: tpu_custom_call.1
= control target key start
LH: loop header
LB: loop body
LE: loop exit
PB: predicated region body
PF: predicated region fallthrough
CT: control target
= control target key end

     0   :  { %s4305_s0 = inlined_call_operand.hbm [shape: bf16[128,128], index: 0, kind: input, shape index: {}]   ;;  %s4306_s1 = inlined_call_operand.hbm [shape: bf16[8,128], index: 1, kind: input, shape index: {}]   ;;  %s4307_s2 = inlined_call_operand.hbm [shape: bf16[128,128], index: 2, kind: input, shape index: {}]   ;;  %s4308_s3 = inlined_call_operand.hbm [shape: bf16[128,128], index: 3, kind: input, shape index: {}]   ;;  %s4309_s4 = inlined_call_operand.vmem [shape: f32[1,128], index: 4, kind: input, shape index: {}]   ;;  %s4310_s5 = inlined_call_operand.hbm [shape: bf16[128,128], index: 5, kind: input, shape index: {}]   ;;  %s4311_s6 = inlined_call_operand.vmem [shape: f32[1,128], index: 6, kind: input, shape index: {}]   ;;  %s4312_s7 = inlined_call_operand.hbm [shape: bf16[128,128], index: 7, kind: input, shape index: {}]   ;;  %s4313_s8 = inlined_call_operand.vmem [shape: f32[1,128], index: 8, kind: input, shape index: {}]   ;;  %s4314_s9 = inlined_call_operand.hbm [shape: bf16[128,128], index: 9, kind: input, shape index: {}]   ;;  %s4315_s10 = inlined_call_operand.vmem [shape: f32[1,128], index: 10, kind: input, shape index: {}]   ;;  %s4316_s11 = inlined_call_operand.hbm [shape: bf16[128,128], index: 11, kind: input, shape index: {}]   ;;  %s4317_s12 = inlined_call_operand.vmem [shape: f32[1,128], index: 12, kind: input, shape index: {}]   ;;  %s4318_s13 = inlined_call_operand.hbm [shape: bf16[128,128], index: 13, kind: input, shape index: {}]   ;;  %s4319_s14 = inlined_call_operand.vmem [shape: f32[1,128], index: 14, kind: input, shape index: {}]   ;;  %s4320_s15 = inlined_call_operand.hbm [shape: bf16[128,128], index: 15, kind: input, shape index: {}]   ;;  %s4321_s16 = inlined_call_operand.vmem [shape: f32[1,128], index: 16, kind: input, shape index: {}]   ;;  %s4322_s17 = inlined_call_operand.hbm [shape: bf16[128,128], index: 17, kind: input, shape index: {}]   ;;  %s4323_s18 = inlined_call_operand.vmem [shape: f32[1,128], index: 18, kind: input, shape index: {}]   ;;  %s4324_s19 = inlined_call_operand.hbm [shape: bf16[128,128], index: 19, kind: input, shape index: {}]   ;;  %s4325_s20 = inlined_call_operand.vmem [shape: f32[1,128], index: 20, kind: input, shape index: {}]   ;;  %s4326_s21 = inlined_call_operand.hbm [shape: f32[8,128], index: 21, kind: output, shape index: {}]  }
   0x1   :  { %4327 = sst [smem:[#allocation36_spill]] %s4305_s0 }
   0x2   :  { %4328 = sst [smem:[#allocation37_spill]] %s4306_s1 }
   0x3   :  { %4329 = sst [smem:[#allocation38_spill]] %s4307_s2 }
   0x4   :  { %4330 = sst [smem:[#allocation39_spill]] %s4308_s3 }
   0x5   :  { %4331 = sst [smem:[#allocation40_spill]] %s4309_s4 }
   0x6   :  { %4332 = sst [smem:[#allocation41_spill]] %s4310_s5 }
   0x7   :  { %26 = vsyncpa [#allocation6], 0 }
   0x8   :  { %27 = vsyncpa [#allocation9], 0 }
   0x9   :  { %28 = vsyncpa [#allocation12], 0 }
   0xa   :  { %29 = vsyncpa [#allocation15], 0 }
   0xb   :  { %30 = vsyncpa [#allocation18], 0 }
   0xc   :  { %31 = vsyncpa [#allocation21], 0  ;;  %s4333_s26 = sld [smem:[#allocation38_spill]] }
  0x12   :  { %s48_s27 = sshll.u32 %s4333_s26, 4  ;;  %s49_s27 = int_to_ptr.hbm [resolvable:$true] %s48_s27 }
  0x13   :  { %32 = vsyncpa [#allocation7], 0  ;;  %s3869_s3 = smov [#allocation8]   ;;  %s4334_s4 = sld [smem:[#allocation41_spill]] }
  0x14   :  { %s50_s28 = sshll.u32 %s3869_s3, 4  ;;  %s3870_s5 = smov 64   ;;  %s51_s28 = int_to_ptr.vmem [resolvable:$true] %s50_s28 }
  0x15   :  { %s3871_s22 = smov 4   ;;  %s3872_s23 = smov [#allocation11]  }
  0x16   :  { %56 = dma.hbm_to_vmem [thread:$0]  %s49_s27, 1024, %s51_s28, [#allocation9], %s3870_s5, %s3870_s5, %s3871_s22  }
  0x17   :  { %s78_s1 = sshll.u32 %s3872_s23, 4  ;;  %s106_s25 = sshll.u32 %s4314_s9, 4  ;;  %s79_s1 = int_to_ptr.vmem [resolvable:$true] %s78_s1  ;;  %s107_s25 = int_to_ptr.hbm [resolvable:$true] %s106_s25 }
  0x18   :  { %s136_s29 = sshll.u32 %s4318_s13, 4  ;;  %s3873_s0 = smov [#allocation14]   ;;  %s137_s29 = int_to_ptr.hbm [resolvable:$true] %s136_s29 }
  0x19   :  { %s76_s30 = sshll.u32 %s4334_s4, 4  ;;  %s108_s4 = sshll.u32 %s3873_s0, 4  ;;  %s77_s30 = int_to_ptr.hbm [resolvable:$true] %s76_s30  ;;  %s109_s4 = int_to_ptr.vmem [resolvable:$true] %s108_s4 }
  0x1a   :  { %84 = dma.hbm_to_vmem [thread:$0]  %s77_s30, 1024, %s79_s1, [#allocation12], %s3870_s5, %s3870_s5, %s3871_s22  }
  0x1b   :  { %114 = dma.hbm_to_vmem [thread:$0]  %s107_s25, 1024, %s109_s4, [#allocation15], %s3870_s5, %s3870_s5, %s3871_s22  }
  0x1c   :  { %s3874_s27 = smov [#allocation17]   ;;  %s166_s24 = sshll.u32 %s4322_s17, 4  ;;  %s167_s24 = int_to_ptr.hbm [resolvable:$true] %s166_s24 }
  0x1d   :  { %s138_s9 = sshll.u32 %s3874_s27, 4  ;;  %s4335_s1 = sld [smem:[#allocation37_spill]]  ;;  %s139_s9 = int_to_ptr.vmem [resolvable:$true] %s138_s9 }
  0x1e   :  { %144 = dma.hbm_to_vmem [thread:$0]  %s137_s29, 1024, %s139_s9, [#allocation18], %s3870_s5, %s3870_s5, %s3871_s22  }
  0x1f   :  { %s3875_s26 = smov [#allocation20]   ;;  %s3876_s25 = smov [#allocation5]  }
  0x20   :  { %s168_s3 = sshll.u32 %s3875_s26, 4  ;;  %s40_s17 = sshll.u32 %s3876_s25, 4  ;;  %s169_s3 = int_to_ptr.vmem [resolvable:$true] %s168_s3  ;;  %s41_s17 = int_to_ptr.vmem [resolvable:$true] %s40_s17 }
  0x21   :  { %174 = dma.hbm_to_vmem [thread:$0]  %s167_s24, 1024, %s169_s3, [#allocation21], %s3870_s5, %s3870_s5, %s3871_s22  }
  0x22   :  { %s4336_s27 = sld [smem:[#allocation39_spill]]  ;;  %s91_s23 = sshll.u32 %s4312_s7, 4  ;;  %s92_s23 = int_to_ptr.hbm [resolvable:$true] %s91_s23 }
  0x23   :  { %s38_s2 = sshll.u32 %s4335_s1, 4  ;;  %s3877_s13 = smov [#allocation10]   ;;  %s39_s2 = int_to_ptr.hbm [resolvable:$true] %s38_s2 }
  0x24   :  { %43 = dma.hbm_to_vmem [thread:$0]  %s39_s2, 64, %s41_s17, [#allocation6]  }
  0x25   :  { %s63_s30 = sshll.u32 %s3877_s13, 4  ;;  %s3878_s24 = smov [#allocation13]   ;;  %s64_s30 = int_to_ptr.vmem [resolvable:$true] %s63_s30 }
  0x26   :  { %s93_s1 = sshll.u32 %s3878_s24, 4  ;;  %s121_s25 = sshll.u32 %s4316_s11, 4  ;;  %s94_s1 = int_to_ptr.vmem [resolvable:$true] %s93_s1  ;;  %s122_s25 = int_to_ptr.hbm [resolvable:$true] %s121_s25 }
  0x27   :  { %99 = dma.hbm_to_vmem [thread:$0]  %s92_s23, 1024, %s94_s1, [#allocation12], %s3870_s5, %s3870_s5, %s3871_s22  }
  0x28   :  { %s61_s28 = sshll.u32 %s4336_s27, 4  ;;  %s151_s17 = sshll.u32 %s4320_s15, 4  ;;  %s62_s28 = int_to_ptr.hbm [resolvable:$true] %s61_s28  ;;  %s152_s17 = int_to_ptr.hbm [resolvable:$true] %s151_s17 }
  0x29   :  { %69 = dma.hbm_to_vmem [thread:$0]  %s62_s28, 1024, %s64_s30, [#allocation9], %s3870_s5, %s3870_s5, %s3871_s22  }
  0x2a   :  { %s3879_s0 = smov [#allocation16]   ;;  %s3880_s27 = smov [#allocation19]  }
  0x2b   :  { %s123_s4 = sshll.u32 %s3879_s0, 4  ;;  %s153_s11 = sshll.u32 %s3880_s27, 4  ;;  %s124_s4 = int_to_ptr.vmem [resolvable:$true] %s123_s4  ;;  %s154_s11 = int_to_ptr.vmem [resolvable:$true] %s153_s11 }
  0x2c   :  { %129 = dma.hbm_to_vmem [thread:$0]  %s122_s25, 1024, %s124_s4, [#allocation15], %s3870_s5, %s3870_s5, %s3871_s22  }
  0x2d   :  { %s181_s9 = sshll.u32 %s4324_s19, 4  ;;  %s3881_s15 = smov [#allocation22]   ;;  %s182_s9 = int_to_ptr.hbm [resolvable:$true] %s181_s9 }
  0x2e   :  { %159 = dma.hbm_to_vmem [thread:$0]  %s152_s17, 1024, %s154_s11, [#allocation18], %s3870_s5, %s3870_s5, %s3871_s22  }
  0x2f   :  { %s183_s23 = sshll.u32 %s3881_s15, 4  ;;  %s184_s23 = int_to_ptr.vmem [resolvable:$true] %s183_s23 }
  0x30   :  { %189 = dma.hbm_to_vmem [thread:$0]  %s182_s9, 1024, %s184_s23, [#allocation21], %s3870_s5, %s3870_s5, %s3871_s22  }
  0x31   :  { %3853 = dma.done.wait [#allocation6], 64  }
  0x32   :  { %3854 = vsyncadd [#allocation6], 4294967232 }
  0x33   :  { %3855 = dma.done.wait [#allocation9], 2048  }
  0x34   :  { %3856 = vsyncadd [#allocation9], 4294965248 }
  0x35   :  { %3857 = dma.done.wait [#allocation12], 2048  }
  0x36   :  { %3858 = vsyncadd [#allocation12], 4294965248 }
  0x37   :  { %3859 = dma.done.wait [#allocation15], 2048  }
  0x38   :  { %3860 = vsyncadd [#allocation15], 4294965248 }
  0x39   :  { %3861 = dma.done.wait [#allocation18], 2048  }
  0x3a   :  { %3862 = vsyncadd [#allocation18], 4294965248 }
  0x3b   :  { %3863 = dma.done.wait [#allocation21], 2048  }
  0x3c   :  { %3864 = vsyncadd [#allocation21], 4294965248  ;;  %s4337_s30 = sld [smem:[#allocation36_spill]]  ;;  %s3882_s1 = smov [#allocation2]   ;;  %v2570_v0 = vld [vmem:[#allocation8] sm:$0xf] }
  0x3d   :  { %s245_s26 = sshll.u32 %s3882_s1, 4  ;;  %v3085_v1 = vld [vmem:[#allocation8] sm:$0xf0]  ;;  %v2574_v2 = vld [vmem:[#allocation8 + $0x8] sm:$0xf]  ;;  %s246_s26 = int_to_ptr.vmem [resolvable:$true] %s245_s26 }
  0x3e   :  { %v3086_v3 = vld [vmem:[#allocation8 + $0x8] sm:$0xf0]  ;;  %v2578_v4 = vld [vmem:[#allocation8 + $0x10] sm:$0xf]  ;;  %v3087_v5 = vld [vmem:[#allocation8 + $0x10] sm:$0xf0] }
  0x3f   :  { %v2582_v6 = vld [vmem:[#allocation8 + $0x18] sm:$0xf]  ;;  %v3088_v7 = vld [vmem:[#allocation8 + $0x18] sm:$0xf0]  ;;  %v2586_v8 = vld [vmem:[#allocation8 + $0x20] sm:$0xf] }
  0x40   :  { %v3089_v9 = vld [vmem:[#allocation8 + $0x20] sm:$0xf0]  ;;  %v2590_v10 = vld [vmem:[#allocation8 + $0x28] sm:$0xf]  ;;  %v3090_v11 = vld [vmem:[#allocation8 + $0x28] sm:$0xf0] }
  0x41   :  { %v2594_v12 = vld [vmem:[#allocation8 + $0x30] sm:$0xf]  ;;  %v3091_v13 = vld [vmem:[#allocation8 + $0x30] sm:$0xf0]  ;;  %v2598_v14 = vld [vmem:[#allocation8 + $0x38] sm:$0xf] }
  0x42   :  { %s243_s24 = sshll.u32 %s4337_s30, 4  ;;  %v3092_v15 = vld [vmem:[#allocation8 + $0x38] sm:$0xf0]  ;;  %s244_s24 = int_to_ptr.hbm [resolvable:$true] %s243_s24 }
  0x43   :  { %248 = dma.hbm_to_vmem [thread:$0]  %s244_s24, 1024, %s246_s26, [#allocation4]  ;;  %v2599_v16 = vor.u32 %v3092_v15, %v2598_v14 }
  0x44   :  { %3865 = dma.done.wait [#allocation4], 1024 }
  0x45   :  { %3866 = vsyncadd [#allocation4], 4294966272  ;;  %381 = vmatpush.bf16.msra.mxu0 %v2599_v16  ;;  %v2595_v17 = vor.u32 %v3091_v13, %v2594_v12  ;;  %3236 = vmatpush.bf16.msra.mxu2 %v2599_v16  ;;  %v2591_v18 = vor.u32 %v3090_v11, %v2590_v10  ;;  %v2587_v19 = vor.u32 %v3089_v9, %v2586_v8  ;;  %v3093_v24 = vld [vmem:[#allocation2] sm:$0xff]  ;;  %v3094_v25 = vld [vmem:[#allocation2 + $0x8] sm:$0xff]  ;;  %s4338_s3 = sld [smem:[#allocation40_spill]]  ;;  %s2508_s19 = sshll.u32 %s4326_s21, 4  ;;  %s2509_s19 = int_to_ptr.hbm [resolvable:$true] %s2508_s19 }
  0x46   :  { %3237 = vmatpush.bf16.msra.mxu3 %v2599_v16  ;;  %v2583_v20 = vor.u32 %v3088_v7, %v2582_v6  ;;  %v2579_v21 = vor.u32 %v3087_v5, %v2578_v4  ;;  %v2575_v22 = vor.u32 %v3086_v3, %v2574_v2  ;;  %v2571_v23 = vor.u32 %v3085_v1, %v2570_v0  ;;  %v3097_v26 = vld [vmem:[#allocation2 + $0x20] sm:$0xff]  ;;  %v3099_v27 = vld [vmem:[#allocation2 + $0x30] sm:$0xff]  ;;  %v3098_v33 = vld [vmem:[#allocation2 + $0x28] sm:$0xff] }
  0x47   :  { %v3108_v28 = vld [vmem:[#allocation10 + $0x38] sm:$0xff]  ;;  %v3107_v29 = vld [vmem:[#allocation10 + $0x30] sm:$0xff]  ;;  %v3106_v30 = vld [vmem:[#allocation10 + $0x28] sm:$0xff] }
  0x48   :  { %506 = vmatpush.bf16.msra.mxu1 %v3108_v28  ;;  %v3105_v31 = vld [vmem:[#allocation10 + $0x20] sm:$0xff]  ;;  %v3095_v32 = vld [vmem:[#allocation2 + $0x10] sm:$0xff]  ;;  %v3100_v34 = vld [vmem:[#allocation2 + $0x38] sm:$0xff] }
  0x49   :  { %382 = vmatpush.bf16.msra.mxu0 %v2595_v17  ;;  %3238 = vmatpush.bf16.msra.mxu2 %v2595_v17  ;;  %v3104_v35 = vld [vmem:[#allocation10 + $0x18] sm:$0xff]  ;;  %v3103_v37 = vld [vmem:[#allocation10 + $0x10] sm:$0xff]  ;;  %v3102_v38 = vld [vmem:[#allocation10 + $0x8] sm:$0xff] }
  0x4a   :  { %3239 = vmatpush.bf16.msra.mxu3 %v2595_v17  ;;  %v3096_v36 = vld [vmem:[#allocation2 + $0x18] sm:$0xff]  ;;  %v3101_v39 = vld [vmem:[#allocation10] sm:$0xff]  ;;  %v3114_v63 = vld [vmem:[#allocation11 + $0x28] sm:$0xff] }
  0x4b   :  { %v3116_v59 = vld [vmem:[#allocation11 + $0x38] sm:$0xff]  ;;  %v3115_v61 = vld [vmem:[#allocation11 + $0x30] sm:$0xff]  ;;  %v3113_v1 = vld [vmem:[#allocation11 + $0x20] sm:$0xff] }
  0x4c   :  { %507 = vmatpush.bf16.msra.mxu1 %v3107_v29  ;;  %v3112_v2 = vld [vmem:[#allocation11 + $0x18] sm:$0xff]  ;;  %v3111_v4 = vld [vmem:[#allocation11 + $0x10] sm:$0xff]  ;;  %v3110_v6 = vld [vmem:[#allocation11 + $0x8] sm:$0xff] }
  0x4d   :  { %383 = vmatpush.bf16.msra.mxu0 %v2591_v18  ;;  %3240 = vmatpush.bf16.msra.mxu2 %v2591_v18  ;;  %v3109_v7 = vld [vmem:[#allocation11] sm:$0xff]  ;;  %v4063_v8 = vld [vmem:[%s4338_s3] ss:$0 sm:$0xff] }
  0x4e   :  { %3241 = vmatpush.bf16.msra.mxu3 %v2591_v18 }
  0x50   :  { %508 = vmatpush.bf16.msra.mxu1 %v3106_v30 }
  0x51   :  { %384 = vmatpush.bf16.msra.mxu0 %v2587_v19  ;;  %3242 = vmatpush.bf16.msra.mxu2 %v2587_v19 }
  0x52   :  { %3243 = vmatpush.bf16.msra.mxu3 %v2587_v19 }
  0x54   :  { %509 = vmatpush.bf16.msra.mxu1 %v3105_v31 }
  0x55   :  { %385 = vmatpush.bf16.msra.mxu0 %v2583_v20  ;;  %3244 = vmatpush.bf16.msra.mxu2 %v2583_v20 }
  0x56   :  { %3245 = vmatpush.bf16.msra.mxu3 %v2583_v20 }
  0x58   :  { %510 = vmatpush.bf16.msra.mxu1 %v3104_v35 }
  0x59   :  { %386 = vmatpush.bf16.msra.mxu0 %v2579_v21  ;;  %3246 = vmatpush.bf16.msra.mxu2 %v2579_v21 }
  0x5a   :  { %3247 = vmatpush.bf16.msra.mxu3 %v2579_v21 }
  0x5c   :  { %511 = vmatpush.bf16.msra.mxu1 %v3103_v37 }
  0x5d   :  { %387 = vmatpush.bf16.msra.mxu0 %v2575_v22  ;;  %3248 = vmatpush.bf16.msra.mxu2 %v2575_v22 }
  0x5e   :  { %3249 = vmatpush.bf16.msra.mxu3 %v2575_v22 }
  0x60   :  { %512 = vmatpush.bf16.msra.mxu1 %v3102_v38 }
  0x61   :  { %388 = vmatpush.bf16.msra.mxu0 %v2571_v23  ;;  %3250 = vmatpush.bf16.msra.mxu2 %v2571_v23 }
  0x62   :  { %3251 = vmatpush.bf16.msra.mxu3 %v2571_v23 }
  0x64   :  { %389 = vmatmul.bf16.vlgmr.msra.gmra.mxu0 %v3093_v24  ;;  %409 = vmatmul.bf16.vlgmr.msra.gmra.mxu2 %v3097_v26 }
  0x65   :  { %419 = vmatmul.bf16.vlgmr.msra.gmra.mxu3 %v3099_v27  ;;  %513 = vmatpush.bf16.msra.mxu1 %v3101_v39 }
  0x66   :  { %727 = vmatpush.bf16.msrb.mxu2 %v3116_v59 }
  0x6a   :  { %728 = vmatpush.bf16.msrb.mxu2 %v3115_v61 }
  0x6e   :  { %729 = vmatpush.bf16.msrb.mxu2 %v3114_v63 }
  0x72   :  { %730 = vmatpush.bf16.msrb.mxu2 %v3113_v1 }
  0x74   :  { %394 = vmatmul.bf16.gmra.mxu0 %v3094_v25  ;;  %414 = vmatmul.bf16.gmra.mxu2 %v3098_v33 }
  0x75   :  { %424 = vmatmul.bf16.gmra.mxu3 %v3100_v34 }
  0x76   :  { %731 = vmatpush.bf16.msrb.mxu2 %v3112_v2 }
  0x7a   :  { %732 = vmatpush.bf16.msrb.mxu2 %v3111_v4 }
  0x7e   :  { %733 = vmatpush.bf16.msrb.mxu2 %v3110_v6 }
  0x82   :  { %734 = vmatpush.bf16.msrb.mxu2 %v3109_v7 }
  0x84   :  { %399 = vmatmul.bf16.gmra.mxu0 %v3095_v32 }
  0x94   :  { %404 = vmatmul.bf16.gmra.mxu0 %v3096_v36 }
  0xe1   :  { %v390_v40 = vpop.f32.mrf.mxu0 }
  0xe7   :  { %v410_v51 = vpop.f32.mrf.mxu2 }
  0xe8   :  { %v420_v57 = vpop.f32.mrf.mxu3 }
  0xe9   :  { %v392_v41 = vpop.f32.mrf.mxu0 }
  0xea   :  { %v430_v42 = vpack.c.bf16 %v392_v41, %v390_v40 }
  0xec   :  { %514 = vmatmul.bf16.vlgmr.msra.gmra.mxu1 %v430_v42 }
  0xef   :  { %v412_v53 = vpop.f32.mrf.mxu2 }
  0xf0   :  { %v434_v54 = vpack.c.bf16 %v412_v53, %v410_v51  ;;  %v422_v60 = vpop.f32.mrf.mxu3 }
  0xf1   :  { %v395_v43 = vpop.f32.mrf.mxu0  ;;  %v436_v62 = vpack.c.bf16 %v422_v60, %v420_v57 }
  0xf7   :  { %v415_v55 = vpop.f32.mrf.mxu2 }
  0xf8   :  { %v425_v0 = vpop.f32.mrf.mxu3 }
  0xf9   :  { %v397_v44 = vpop.f32.mrf.mxu0 }
  0xfa   :  { %v431_v45 = vpack.c.bf16 %v397_v44, %v395_v43 }
  0xfc   :  { %519 = vmatmul.bf16.gmra.mxu1 %v431_v45 }
  0xff   :  { %v417_v56 = vpop.f32.mrf.mxu2 }
 0x100   :  { %v435_v58 = vpack.c.bf16 %v417_v56, %v415_v55  ;;  %v427_v3 = vpop.f32.mrf.mxu3 }
 0x101   :  { %v400_v46 = vpop.f32.mrf.mxu0  ;;  %v437_v5 = vpack.c.bf16 %v427_v3, %v425_v0 }
 0x109   :  { %v402_v47 = vpop.f32.mrf.mxu0 }
 0x10a   :  { %v432_v48 = vpack.c.bf16 %v402_v47, %v400_v46 }
 0x10c   :  { %524 = vmatmul.bf16.gmra.mxu1 %v432_v48 }
 0x111   :  { %v405_v49 = vpop.f32.mrf.mxu0 }
 0x119   :  { %v407_v50 = vpop.f32.mrf.mxu0 }
 0x11a   :  { %v433_v52 = vpack.c.bf16 %v407_v50, %v405_v49 }
 0x11c   :  { %529 = vmatmul.bf16.gmra.mxu1 %v433_v52 }
 0x12c   :  { %534 = vmatmul.bf16.gmra.mxu1 %v434_v54 }
 0x13c   :  { %539 = vmatmul.bf16.gmra.mxu1 %v435_v58 }
 0x14c   :  { %544 = vmatmul.bf16.gmra.mxu1 %v436_v62 }
 0x15c   :  { %549 = vmatmul.bf16.gmra.mxu1 %v437_v5 }
 0x169   :  { %v515_v9 = vpop.f32.mrf.mxu1 }
 0x16a   :  { %v516_v10 = vadd.f32 %v4063_v8, %v515_v9 }
 0x16c   :  { %v571_v11 = vmin.f32 %v516_v10, 0.0  ;;  %vm555_vm0 = vcmp.gt.f32.partialorder %v516_v10, 0.0 }
 0x16e   :  { %v587_v12 = vmul.f32 1.442695, %v571_v11 }
 0x170   :  { %3276 = vpow2.f32 %v587_v12 }
 0x171   :  { %v517_v13 = vpop.f32.mrf.mxu1 }
 0x172   :  { %v518_v14 = vadd.f32 %v4063_v8, %v517_v13 }
 0x174   :  { %v572_v15 = vmin.f32 %v518_v14, 0.0  ;;  %vm556_vm1 = vcmp.gt.f32.partialorder %v518_v14, 0.0 }
 0x176   :  { %v589_v16 = vmul.f32 1.442695, %v572_v15  ;;  %v3277_v18 = vpop.eup %3276 }
 0x177   :  { %v2632_v21 = vadd.f32 -1.0, %v3277_v18 }
 0x178   :  { %3278 = vpow2.f32 %v589_v16 }
 0x179   :  { %v520_v17 = vpop.f32.mrf.mxu1  ;;  %v635_v26 = vsel %vm555_vm0, %v516_v10, %v2632_v21 }
 0x17a   :  { %v521_v19 = vadd.f32 %v4063_v8, %v520_v17 }
 0x17c   :  { %v573_v20 = vmin.f32 %v521_v19, 0.0  ;;  %vm557_vm2 = vcmp.gt.f32.partialorder %v521_v19, 0.0 }
 0x17e   :  { %v3279_v22 = vpop.eup %3278  ;;  %v591_v24 = vmul.f32 1.442695, %v573_v20 }
 0x17f   :  { %v2633_v23 = vadd.f32 -1.0, %v3279_v22 }
 0x180   :  { %3280 = vpow2.f32 %v591_v24 }
 0x181   :  { %v522_v25 = vpop.f32.mrf.mxu1  ;;  %v636_v27 = vsel %vm556_vm1, %v518_v14, %v2633_v23 }
 0x182   :  { %v523_v28 = vadd.f32 %v4063_v8, %v522_v25  ;;  %v651_v29 = vpack.c.bf16 %v636_v27, %v635_v26 }
 0x184   :  { %v574_v30 = vmin.f32 %v523_v28, 0.0  ;;  %735 = vmatmul.bf16.vlgmr.msrb.gmra.mxu2 %v651_v29  ;;  %vm558_vm3 = vcmp.gt.f32.partialorder %v523_v28, 0.0 }
 0x186   :  { %v593_v31 = vmul.f32 1.442695, %v574_v30  ;;  %v3281_v33 = vpop.eup %3280 }
 0x187   :  { %v2634_v36 = vadd.f32 -1.0, %v3281_v33 }
 0x188   :  { %3282 = vpow2.f32 %v593_v31 }
 0x189   :  { %v525_v32 = vpop.f32.mrf.mxu1  ;;  %v637_v41 = vsel %vm557_vm2, %v521_v19, %v2634_v36 }
 0x18a   :  { %v526_v34 = vadd.f32 %v4063_v8, %v525_v32 }
 0x18c   :  { %v575_v35 = vmin.f32 %v526_v34, 0.0  ;;  %vm559_vm4 = vcmp.gt.f32.partialorder %v526_v34, 0.0 }
 0x18e   :  { %v3283_v37 = vpop.eup %3282  ;;  %v595_v39 = vmul.f32 1.442695, %v575_v35 }
 0x18f   :  { %v2635_v38 = vadd.f32 -1.0, %v3283_v37 }
 0x190   :  { %3284 = vpow2.f32 %v595_v39 }
 0x191   :  { %v527_v40 = vpop.f32.mrf.mxu1  ;;  %v638_v42 = vsel %vm558_vm3, %v523_v28, %v2635_v38 }
 0x192   :  { %v528_v43 = vadd.f32 %v4063_v8, %v527_v40  ;;  %v652_v44 = vpack.c.bf16 %v638_v42, %v637_v41 }
 0x194   :  { %v576_v45 = vmin.f32 %v528_v43, 0.0  ;;  %740 = vmatmul.bf16.gmra.mxu2 %v652_v44  ;;  %vm560_vm5 = vcmp.gt.f32.partialorder %v528_v43, 0.0 }
 0x196   :  { %v597_v46 = vmul.f32 1.442695, %v576_v45  ;;  %v3285_v48 = vpop.eup %3284 }
 0x197   :  { %v2636_v51 = vadd.f32 -1.0, %v3285_v48 }
 0x198   :  { %3286 = vpow2.f32 %v597_v46 }
 0x199   :  { %v530_v47 = vpop.f32.mrf.mxu1  ;;  %v639_v56 = vsel %vm559_vm4, %v526_v34, %v2636_v51 }
 0x19a   :  { %v531_v49 = vadd.f32 %v4063_v8, %v530_v47 }
 0x19c   :  { %v577_v50 = vmin.f32 %v531_v49, 0.0  ;;  %vm561_vm6 = vcmp.gt.f32.partialorder %v531_v49, 0.0 }
 0x19e   :  { %v3287_v52 = vpop.eup %3286  ;;  %v599_v54 = vmul.f32 1.442695, %v577_v50 }
 0x19f   :  { %v2637_v53 = vadd.f32 -1.0, %v3287_v52 }
 0x1a0   :  { %3288 = vpow2.f32 %v599_v54 }
 0x1a1   :  { %v532_v55 = vpop.f32.mrf.mxu1  ;;  %v640_v57 = vsel %vm560_vm5, %v528_v43, %v2637_v53 }
 0x1a2   :  { %v533_v58 = vadd.f32 %v4063_v8, %v532_v55  ;;  %v653_v59 = vpack.c.bf16 %v640_v57, %v639_v56 }
 0x1a4   :  { %v578_v60 = vmin.f32 %v533_v58, 0.0  ;;  %745 = vmatmul.bf16.gmra.mxu2 %v653_v59  ;;  %vm562_vm7 = vcmp.gt.f32.partialorder %v533_v58, 0.0 }
 0x1a6   :  { %v601_v61 = vmul.f32 1.442695, %v578_v60  ;;  %v3289_v63 = vpop.eup %3288 }
 0x1a7   :  { %v2638_v2 = vadd.f32 -1.0, %v3289_v63 }
 0x1a8   :  { %3290 = vpow2.f32 %v601_v61 }
 0x1a9   :  { %v535_v62 = vpop.f32.mrf.mxu1  ;;  %v641_v7 = vsel %vm561_vm6, %v531_v49, %v2638_v2 }
 0x1aa   :  { %v536_v0 = vadd.f32 %v4063_v8, %v535_v62 }
 0x1ac   :  { %v579_v1 = vmin.f32 %v536_v0, 0.0  ;;  %vm563_vm8 = vcmp.gt.f32.partialorder %v536_v0, 0.0 }
 0x1ae   :  { %v3291_v3 = vpop.eup %3290  ;;  %v603_v5 = vmul.f32 1.442695, %v579_v1 }
 0x1af   :  { %v2639_v4 = vadd.f32 -1.0, %v3291_v3 }
 0x1b0   :  { %3292 = vpow2.f32 %v603_v5 }
 0x1b1   :  { %v537_v6 = vpop.f32.mrf.mxu1  ;;  %v642_v9 = vsel %vm562_vm7, %v533_v58, %v2639_v4 }
 0x1b2   :  { %v538_v10 = vadd.f32 %v4063_v8, %v537_v6  ;;  %v654_v11 = vpack.c.bf16 %v642_v9, %v641_v7 }
 0x1b4   :  { %v580_v12 = vmin.f32 %v538_v10, 0.0  ;;  %750 = vmatmul.bf16.gmra.mxu2 %v654_v11  ;;  %vm564_vm9 = vcmp.gt.f32.partialorder %v538_v10, 0.0 }
 0x1b6   :  { %v605_v13 = vmul.f32 1.442695, %v580_v12  ;;  %v3293_v15 = vpop.eup %3292 }
 0x1b7   :  { %v2640_v18 = vadd.f32 -1.0, %v3293_v15 }
 0x1b8   :  { %3294 = vpow2.f32 %v605_v13 }
 0x1b9   :  { %v540_v14 = vpop.f32.mrf.mxu1  ;;  %v643_v23 = vsel %vm563_vm8, %v536_v0, %v2640_v18 }
 0x1ba   :  { %v541_v16 = vadd.f32 %v4063_v8, %v540_v14 }
 0x1bc   :  { %v581_v17 = vmin.f32 %v541_v16, 0.0  ;;  %vm565_vm10 = vcmp.gt.f32.partialorder %v541_v16, 0.0 }
 0x1be   :  { %v3295_v19 = vpop.eup %3294  ;;  %v607_v21 = vmul.f32 1.442695, %v581_v17 }
 0x1bf   :  { %v2641_v20 = vadd.f32 -1.0, %v3295_v19 }
 0x1c0   :  { %3296 = vpow2.f32 %v607_v21 }
 0x1c1   :  { %v542_v22 = vpop.f32.mrf.mxu1  ;;  %v644_v24 = vsel %vm564_vm9, %v538_v10, %v2641_v20 }
 0x1c2   :  { %v543_v25 = vadd.f32 %v4063_v8, %v542_v22  ;;  %v655_v26 = vpack.c.bf16 %v644_v24, %v643_v23 }
 0x1c4   :  { %v582_v27 = vmin.f32 %v543_v25, 0.0  ;;  %755 = vmatmul.bf16.gmra.mxu2 %v655_v26  ;;  %vm566_vm11 = vcmp.gt.f32.partialorder %v543_v25, 0.0 }
 0x1c6   :  { %v609_v28 = vmul.f32 1.442695, %v582_v27  ;;  %v3297_v30 = vpop.eup %3296 }
 0x1c7   :  { %v2642_v33 = vadd.f32 -1.0, %v3297_v30 }
 0x1c8   :  { %3298 = vpow2.f32 %v609_v28 }
 0x1c9   :  { %v545_v29 = vpop.f32.mrf.mxu1  ;;  %v645_v38 = vsel %vm565_vm10, %v541_v16, %v2642_v33 }
 0x1ca   :  { %v546_v31 = vadd.f32 %v4063_v8, %v545_v29 }
 0x1cc   :  { %v583_v32 = vmin.f32 %v546_v31, 0.0  ;;  %vm567_vm12 = vcmp.gt.f32.partialorder %v546_v31, 0.0 }
 0x1ce   :  { %v3299_v34 = vpop.eup %3298  ;;  %v611_v36 = vmul.f32 1.442695, %v583_v32 }
 0x1cf   :  { %v2643_v35 = vadd.f32 -1.0, %v3299_v34 }
 0x1d0   :  { %3300 = vpow2.f32 %v611_v36 }
 0x1d1   :  { %v547_v37 = vpop.f32.mrf.mxu1  ;;  %v646_v39 = vsel %vm566_vm11, %v543_v25, %v2643_v35 }
 0x1d2   :  { %v548_v40 = vadd.f32 %v4063_v8, %v547_v37  ;;  %v656_v41 = vpack.c.bf16 %v646_v39, %v645_v38 }
 0x1d4   :  { %v584_v42 = vmin.f32 %v548_v40, 0.0  ;;  %760 = vmatmul.bf16.gmra.mxu2 %v656_v41  ;;  %vm568_vm13 = vcmp.gt.f32.partialorder %v548_v40, 0.0 }
 0x1d6   :  { %v613_v43 = vmul.f32 1.442695, %v584_v42  ;;  %v3301_v45 = vpop.eup %3300 }
 0x1d7   :  { %v2644_v48 = vadd.f32 -1.0, %v3301_v45 }
 0x1d8   :  { %3302 = vpow2.f32 %v613_v43 }
 0x1d9   :  { %v550_v44 = vpop.f32.mrf.mxu1  ;;  %v647_v53 = vsel %vm567_vm12, %v546_v31, %v2644_v48 }
 0x1da   :  { %v551_v46 = vadd.f32 %v4063_v8, %v550_v44 }
 0x1dc   :  { %v585_v47 = vmin.f32 %v551_v46, 0.0  ;;  %vm569_vm14 = vcmp.gt.f32.partialorder %v551_v46, 0.0 }
 0x1de   :  { %v3303_v49 = vpop.eup %3302  ;;  %v615_v51 = vmul.f32 1.442695, %v585_v47 }
 0x1df   :  { %v2645_v50 = vadd.f32 -1.0, %v3303_v49 }
 0x1e0   :  { %3304 = vpow2.f32 %v615_v51 }
 0x1e1   :  { %v552_v52 = vpop.f32.mrf.mxu1  ;;  %v648_v54 = vsel %vm568_vm13, %v548_v40, %v2645_v50 }
 0x1e2   :  { %v553_v55 = vadd.f32 %v4063_v8, %v552_v52  ;;  %v657_v56 = vpack.c.bf16 %v648_v54, %v647_v53  ;;  %v4084_v8 = vld [vmem:[%s4311_s6] ss:$0 sm:$0xff] }
 0x1e4   :  { %v586_v57 = vmin.f32 %v553_v55, 0.0  ;;  %765 = vmatmul.bf16.gmra.mxu2 %v657_v56  ;;  %vm570_vm15 = vcmp.gt.f32.partialorder %v553_v55, 0.0 }
 0x1e6   :  { %v617_v58 = vmul.f32 1.442695, %v586_v57  ;;  %v3305_v59 = vpop.eup %3304 }
 0x1e7   :  { %v2646_v60 = vadd.f32 -1.0, %v3305_v59 }
 0x1e8   :  { %3306 = vpow2.f32 %v617_v58 }
 0x1e9   :  { %v649_v63 = vsel %vm569_vm14, %v551_v46, %v2646_v60 }
 0x1ee   :  { %v3307_v61 = vpop.eup %3306 }
 0x1ef   :  { %v2647_v62 = vadd.f32 -1.0, %v3307_v61 }
 0x1f1   :  { %v650_v0 = vsel %vm570_vm15, %v553_v55, %v2647_v62 }
 0x1f2   :  { %v658_v1 = vpack.c.bf16 %v650_v0, %v649_v63 }
 0x1f4   :  { %770 = vmatmul.bf16.gmra.mxu2 %v658_v1 }
 0x207   :  { %v736_v2 = vpop.f32.mrf.mxu2 }
 0x208   :  { %v737_v3 = vadd.f32 %v4084_v8, %v736_v2 }
 0x20a   :  { %v792_v4 = vmin.f32 %v737_v3, 0.0  ;;  %vm776_vm0 = vcmp.gt.f32.partialorder %v737_v3, 0.0 }
 0x20c   :  { %v808_v5 = vmul.f32 1.442695, %v792_v4 }
 0x20e   :  { %3308 = vpow2.f32 %v808_v5 }
 0x20f   :  { %v738_v6 = vpop.f32.mrf.mxu2 }
 0x210   :  { %v739_v7 = vadd.f32 %v4084_v8, %v738_v6 }
 0x212   :  { %v793_v9 = vmin.f32 %v739_v7, 0.0  ;;  %vm777_vm1 = vcmp.gt.f32.partialorder %v739_v7, 0.0 }
 0x214   :  { %v3309_v10 = vpop.eup %3308  ;;  %v810_v11 = vmul.f32 1.442695, %v793_v9 }
 0x215   :  { %v2680_v12 = vadd.f32 -1.0, %v3309_v10 }
 0x216   :  { %3310 = vpow2.f32 %v810_v11 }
 0x217   :  { %v856_v13 = vsel %vm776_vm0, %v737_v3, %v2680_v12  ;;  %v741_v14 = vpop.f32.mrf.mxu2 }
 0x218   :  { %v888_v15 = vmin.f32 %v856_v13, 0.0  ;;  %v742_v16 = vadd.f32 %v4084_v8, %v741_v14  ;;  %vm872_vm3 = vcmp.gt.f32.partialorder %v856_v13, 0.0 }
 0x21a   :  { %v794_v17 = vmin.f32 %v742_v16, 0.0  ;;  %v904_v19 = vmul.f32 1.442695, %v888_v15  ;;  %vm778_vm2 = vcmp.gt.f32.partialorder %v742_v16, 0.0 }
 0x21c   :  { %v3311_v18 = vpop.eup %3310  ;;  %v812_v20 = vmul.f32 1.442695, %v794_v17 }
 0x21d   :  { %v2681_v21 = vadd.f32 -1.0, %v3311_v18 }
 0x21e   :  { %3312 = vpow2.f32 %v812_v20 }
 0x21f   :  { %v857_v22 = vsel %vm777_vm1, %v739_v7, %v2681_v21  ;;  %v743_v23 = vpop.f32.mrf.mxu2  ;;  %3314 = vpow2.f32 %v904_v19 }
 0x220   :  { %v889_v24 = vmin.f32 %v857_v22, 0.0  ;;  %v744_v25 = vadd.f32 %v4084_v8, %v743_v23  ;;  %vm873_vm4 = vcmp.gt.f32.partialorder %v857_v22, 0.0 }
 0x222   :  { %v906_v26 = vmul.f32 1.442695, %v889_v24  ;;  %v795_v27 = vmin.f32 %v744_v25, 0.0  ;;  %vm779_vm5 = vcmp.gt.f32.partialorder %v744_v25, 0.0 }
 0x224   :  { %v3313_v28 = vpop.eup %3312  ;;  %3316 = vpow2.f32 %v906_v26  ;;  %v814_v29 = vmul.f32 1.442695, %v795_v27 }
 0x225   :  { %v2682_v30 = vadd.f32 -1.0, %v3313_v28  ;;  %v3315_v31 = vpop.eup %3314 }
 0x226   :  { %3318 = vpow2.f32 %v814_v29  ;;  %v2696_v36 = vadd.f32 -1.0, %v3315_v31 }
 0x227   :  { %v858_v32 = vsel %vm778_vm2, %v742_v16, %v2682_v30  ;;  %v746_v33 = vpop.f32.mrf.mxu2 }
 0x228   :  { %v890_v34 = vmin.f32 %v858_v32, 0.0  ;;  %v747_v35 = vadd.f32 %v4084_v8, %v746_v33  ;;  %v952_v43 = vsel %vm872_vm3, %v856_v13, %v2696_v36  ;;  %vm874_vm7 = vcmp.gt.f32.partialorder %v858_v32, 0.0 }
 0x22a   :  { %v3317_v37 = vpop.eup %3316  ;;  %v796_v38 = vmin.f32 %v747_v35, 0.0  ;;  %v908_v41 = vmul.f32 1.442695, %v890_v34  ;;  %vm780_vm6 = vcmp.gt.f32.partialorder %v747_v35, 0.0 }
 0x22b   :  { %v2697_v39 = vadd.f32 -1.0, %v3317_v37 }
 0x22c   :  { %v3319_v40 = vpop.eup %3318  ;;  %v816_v42 = vmul.f32 1.442695, %v796_v38 }
 0x22d   :  { %v953_v44 = vsel %vm873_vm4, %v857_v22, %v2697_v39  ;;  %v2683_v45 = vadd.f32 -1.0, %v3319_v40 }
 0x22e   :  { %v3192_v46 = vpack.c.bf16 %v953_v44, %v952_v43  ;;  %3320 = vpow2.f32 %v816_v42 }
 0x22f   :  { %v859_v47 = vsel %vm779_vm5, %v744_v25, %v2683_v45  ;;  %v748_v48 = vpop.f32.mrf.mxu2  ;;  %3322 = vpow2.f32 %v908_v41 }
 0x230   :  { %3193 = vst [vmem:[#allocation3 + $0x30] sm:$0xff] %v3192_v46   ;;  %v891_v49 = vmin.f32 %v859_v47, 0.0  ;;  %v749_v50 = vadd.f32 %v4084_v8, %v748_v48  ;;  %vm875_vm8 = vcmp.gt.f32.partialorder %v859_v47, 0.0 }
 0x232   :  { %v910_v51 = vmul.f32 1.442695, %v891_v49  ;;  %v797_v52 = vmin.f32 %v749_v50, 0.0  ;;  %vm781_vm9 = vcmp.gt.f32.partialorder %v749_v50, 0.0 }
 0x234   :  { %v3321_v53 = vpop.eup %3320  ;;  %3324 = vpow2.f32 %v910_v51  ;;  %v818_v54 = vmul.f32 1.442695, %v797_v52 }
 0x235   :  { %v2684_v55 = vadd.f32 -1.0, %v3321_v53  ;;  %v3323_v56 = vpop.eup %3322 }
 0x236   :  { %3326 = vpow2.f32 %v818_v54  ;;  %v2698_v61 = vadd.f32 -1.0, %v3323_v56 }
 0x237   :  { %v860_v57 = vsel %vm780_vm6, %v747_v35, %v2684_v55  ;;  %v751_v58 = vpop.f32.mrf.mxu2 }
 0x238   :  { %v892_v59 = vmin.f32 %v860_v57, 0.0  ;;  %v752_v60 = vadd.f32 %v4084_v8, %v751_v58  ;;  %v954_v4 = vsel %vm874_vm7, %v858_v32, %v2698_v61  ;;  %vm876_vm11 = vcmp.gt.f32.partialorder %v860_v57, 0.0 }
 0x23a   :  { %v3325_v62 = vpop.eup %3324  ;;  %v798_v63 = vmin.f32 %v752_v60, 0.0  ;;  %v912_v2 = vmul.f32 1.442695, %v892_v59  ;;  %vm782_vm10 = vcmp.gt.f32.partialorder %v752_v60, 0.0 }
 0x23b   :  { %v2699_v0 = vadd.f32 -1.0, %v3325_v62 }
 0x23c   :  { %v3327_v1 = vpop.eup %3326  ;;  %v820_v3 = vmul.f32 1.442695, %v798_v63 }
 0x23d   :  { %v955_v5 = vsel %vm875_vm8, %v859_v47, %v2699_v0  ;;  %v2685_v6 = vadd.f32 -1.0, %v3327_v1 }
 0x23e   :  { %v3197_v7 = vpack.c.bf16 %v955_v5, %v954_v4  ;;  %3328 = vpow2.f32 %v820_v3 }
 0x23f   :  { %v861_v9 = vsel %vm781_vm9, %v749_v50, %v2685_v6  ;;  %v753_v10 = vpop.f32.mrf.mxu2  ;;  %3330 = vpow2.f32 %v912_v2 }
 0x240   :  { %3229 = vst [vmem:[#allocation3] sm:$0xff] %v3197_v7   ;;  %v893_v11 = vmin.f32 %v861_v9, 0.0  ;;  %v754_v12 = vadd.f32 %v4084_v8, %v753_v10  ;;  %vm877_vm12 = vcmp.gt.f32.partialorder %v861_v9, 0.0 }
 0x242   :  { %v914_v13 = vmul.f32 1.442695, %v893_v11  ;;  %v799_v14 = vmin.f32 %v754_v12, 0.0  ;;  %vm783_vm13 = vcmp.gt.f32.partialorder %v754_v12, 0.0 }
 0x244   :  { %v3329_v15 = vpop.eup %3328  ;;  %3332 = vpow2.f32 %v914_v13  ;;  %v822_v16 = vmul.f32 1.442695, %v799_v14 }
 0x245   :  { %v2686_v17 = vadd.f32 -1.0, %v3329_v15  ;;  %v3331_v18 = vpop.eup %3330 }
 0x246   :  { %3334 = vpow2.f32 %v822_v16  ;;  %v2700_v23 = vadd.f32 -1.0, %v3331_v18 }
 0x247   :  { %v862_v19 = vsel %vm782_vm10, %v752_v60, %v2686_v17  ;;  %v756_v20 = vpop.f32.mrf.mxu2 }
 0x248   :  { %v894_v21 = vmin.f32 %v862_v19, 0.0  ;;  %v757_v22 = vadd.f32 %v4084_v8, %v756_v20  ;;  %v956_v30 = vsel %vm876_vm11, %v860_v57, %v2700_v23  ;;  %vm878_vm15 = vcmp.gt.f32.partialorder %v862_v19, 0.0 }
 0x24a   :  { %v3333_v24 = vpop.eup %3332  ;;  %v800_v25 = vmin.f32 %v757_v22, 0.0  ;;  %v916_v28 = vmul.f32 1.442695, %v894_v21  ;;  %vm784_vm14 = vcmp.gt.f32.partialorder %v757_v22, 0.0 }
 0x24b   :  { %v2701_v26 = vadd.f32 -1.0, %v3333_v24 }
 0x24c   :  { %v3335_v27 = vpop.eup %3334  ;;  %v824_v29 = vmul.f32 1.442695, %v800_v25 }
 0x24d   :  { %v957_v31 = vsel %vm877_vm12, %v861_v9, %v2701_v26  ;;  %v2687_v32 = vadd.f32 -1.0, %v3335_v27 }
 0x24e   :  { %v3202_v33 = vpack.c.bf16 %v957_v31, %v956_v30  ;;  %3336 = vpow2.f32 %v824_v29 }
 0x24f   :  { %v863_v34 = vsel %vm783_vm13, %v754_v12, %v2687_v32  ;;  %v758_v35 = vpop.f32.mrf.mxu2  ;;  %3338 = vpow2.f32 %v916_v28 }
 0x250   :  { %3230 = vst [vmem:[#allocation3 + $0x18] sm:$0xff] %v3202_v33   ;;  %v895_v36 = vmin.f32 %v863_v34, 0.0  ;;  %v759_v37 = vadd.f32 %v4084_v8, %v758_v35  ;;  %vm879_vm0 = vcmp.gt.f32.partialorder %v863_v34, 0.0 }
 0x252   :  { %v918_v38 = vmul.f32 1.442695, %v895_v36  ;;  %v801_v39 = vmin.f32 %v759_v37, 0.0  ;;  %vm785_vm1 = vcmp.gt.f32.partialorder %v759_v37, 0.0 }
 0x254   :  { %v3337_v40 = vpop.eup %3336  ;;  %3340 = vpow2.f32 %v918_v38  ;;  %v826_v41 = vmul.f32 1.442695, %v801_v39 }
 0x255   :  { %v2688_v42 = vadd.f32 -1.0, %v3337_v40  ;;  %v3339_v43 = vpop.eup %3338 }
 0x256   :  { %3342 = vpow2.f32 %v826_v41  ;;  %v2702_v48 = vadd.f32 -1.0, %v3339_v43 }
 0x257   :  { %v864_v44 = vsel %vm784_vm14, %v757_v22, %v2688_v42  ;;  %v761_v45 = vpop.f32.mrf.mxu2 }
 0x258   :  { %v896_v46 = vmin.f32 %v864_v44, 0.0  ;;  %v762_v47 = vadd.f32 %v4084_v8, %v761_v45  ;;  %v958_v55 = vsel %vm878_vm15, %v862_v19, %v2702_v48  ;;  %vm880_vm3 = vcmp.gt.f32.partialorder %v864_v44, 0.0 }
 0x25a   :  { %v3341_v49 = vpop.eup %3340  ;;  %v802_v50 = vmin.f32 %v762_v47, 0.0  ;;  %v920_v53 = vmul.f32 1.442695, %v896_v46  ;;  %vm786_vm2 = vcmp.gt.f32.partialorder %v762_v47, 0.0 }
 0x25b   :  { %v2703_v51 = vadd.f32 -1.0, %v3341_v49 }
 0x25c   :  { %v3343_v52 = vpop.eup %3342  ;;  %v828_v54 = vmul.f32 1.442695, %v802_v50 }
 0x25d   :  { %v959_v56 = vsel %vm879_vm0, %v863_v34, %v2703_v51  ;;  %v2689_v57 = vadd.f32 -1.0, %v3343_v52 }
 0x25e   :  { %v3207_v58 = vpack.c.bf16 %v959_v56, %v958_v55  ;;  %3344 = vpow2.f32 %v828_v54 }
 0x25f   :  { %v865_v59 = vsel %vm785_vm1, %v759_v37, %v2689_v57  ;;  %v763_v60 = vpop.f32.mrf.mxu2  ;;  %3346 = vpow2.f32 %v920_v53 }
 0x260   :  { %3231 = vst [vmem:[#allocation3 + $0x10] sm:$0xff] %v3207_v58   ;;  %v897_v61 = vmin.f32 %v865_v59, 0.0  ;;  %v764_v62 = vadd.f32 %v4084_v8, %v763_v60  ;;  %vm881_vm4 = vcmp.gt.f32.partialorder %v865_v59, 0.0 }
 0x262   :  { %v922_v63 = vmul.f32 1.442695, %v897_v61  ;;  %v803_v0 = vmin.f32 %v764_v62, 0.0  ;;  %vm787_vm5 = vcmp.gt.f32.partialorder %v764_v62, 0.0 }
 0x264   :  { %v3345_v1 = vpop.eup %3344  ;;  %3348 = vpow2.f32 %v922_v63  ;;  %v830_v2 = vmul.f32 1.442695, %v803_v0 }
 0x265   :  { %v2690_v3 = vadd.f32 -1.0, %v3345_v1  ;;  %v3347_v4 = vpop.eup %3346 }
 0x266   :  { %3350 = vpow2.f32 %v830_v2  ;;  %v2704_v10 = vadd.f32 -1.0, %v3347_v4 }
 0x267   :  { %v866_v5 = vsel %vm786_vm2, %v762_v47, %v2690_v3  ;;  %v766_v6 = vpop.f32.mrf.mxu2 }
 0x268   :  { %v898_v7 = vmin.f32 %v866_v5, 0.0  ;;  %v767_v9 = vadd.f32 %v4084_v8, %v766_v6  ;;  %v960_v17 = vsel %vm880_vm3, %v864_v44, %v2704_v10  ;;  %vm882_vm7 = vcmp.gt.f32.partialorder %v866_v5, 0.0 }
 0x26a   :  { %v3349_v11 = vpop.eup %3348  ;;  %v804_v12 = vmin.f32 %v767_v9, 0.0  ;;  %v924_v15 = vmul.f32 1.442695, %v898_v7  ;;  %vm788_vm6 = vcmp.gt.f32.partialorder %v767_v9, 0.0 }
 0x26b   :  { %v2705_v13 = vadd.f32 -1.0, %v3349_v11 }
 0x26c   :  { %v3351_v14 = vpop.eup %3350  ;;  %v832_v16 = vmul.f32 1.442695, %v804_v12 }
 0x26d   :  { %v961_v18 = vsel %vm881_vm4, %v865_v59, %v2705_v13  ;;  %v2691_v19 = vadd.f32 -1.0, %v3351_v14 }
 0x26e   :  { %v3212_v20 = vpack.c.bf16 %v961_v18, %v960_v17  ;;  %3352 = vpow2.f32 %v832_v16  ;;  %v3128_v17 = vld [vmem:[#allocation3 + $0x10] sm:$0xff]  ;;  %v3127_v18 = vld [vmem:[#allocation3 + $0x18] sm:$0xff] }
 0x26f   :  { %v867_v21 = vsel %vm787_vm5, %v764_v62, %v2691_v19  ;;  %v768_v22 = vpop.f32.mrf.mxu2  ;;  %3354 = vpow2.f32 %v924_v15  ;;  %v3126_v19 = vld [vmem:[#allocation3] sm:$0xff] }
 0x270   :  { %3232 = vst [vmem:[#allocation3 + $0x8] sm:$0xff] %v3212_v20   ;;  %v899_v23 = vmin.f32 %v867_v21, 0.0  ;;  %v769_v24 = vadd.f32 %v4084_v8, %v768_v22  ;;  %vm883_vm8 = vcmp.gt.f32.partialorder %v867_v21, 0.0  ;;  %v3125_v20 = vld [vmem:[#allocation3 + $0x30] sm:$0xff]  ;;  %v3118_v22 = vld [vmem:[#allocation2 + $0x8] sm:$0xff] }
 0x272   :  { %v926_v25 = vmul.f32 1.442695, %v899_v23  ;;  %v805_v26 = vmin.f32 %v769_v24, 0.0  ;;  %vm789_vm9 = vcmp.gt.f32.partialorder %v769_v24, 0.0  ;;  %v3119_v23 = vld [vmem:[#allocation2 + $0x10] sm:$0xff] }
 0x274   :  { %v3353_v27 = vpop.eup %3352  ;;  %3356 = vpow2.f32 %v926_v25  ;;  %v834_v28 = vmul.f32 1.442695, %v805_v26  ;;  %v4105_v25 = vld [vmem:[#allocation2 + $0x20] sm:$0xff] }
 0x275   :  { %v2692_v29 = vadd.f32 -1.0, %v3353_v27  ;;  %v3355_v30 = vpop.eup %3354  ;;  %v3140_v26 = vld [vmem:[#allocation13 + $0x38] sm:$0xff]  ;;  %v4108_v27 = vld [vmem:[#allocation2 + $0x28] sm:$0xff] }
 0x276   :  { %3358 = vpow2.f32 %v834_v28  ;;  %v2706_v35 = vadd.f32 -1.0, %v3355_v30  ;;  %1253 = vmatpush.bf16.msrb.mxu0 %v3140_v26  ;;  %v3139_v28 = vld [vmem:[#allocation13 + $0x30] sm:$0xff]  ;;  %v3137_v30 = vld [vmem:[#allocation13 + $0x20] sm:$0xff] }
 0x277   :  { %v868_v31 = vsel %vm788_vm6, %v767_v9, %v2692_v29  ;;  %v771_v32 = vpop.f32.mrf.mxu2  ;;  %v3129_v16 = vld [vmem:[#allocation3 + $0x8] sm:$0xff] }
 0x278   :  { %v900_v33 = vmin.f32 %v868_v31, 0.0  ;;  %v772_v34 = vadd.f32 %v4084_v8, %v771_v32  ;;  %v962_v42 = vsel %vm882_vm7, %v866_v5, %v2706_v35  ;;  %vm884_vm11 = vcmp.gt.f32.partialorder %v868_v31, 0.0  ;;  %v3138_v29 = vld [vmem:[#allocation13 + $0x28] sm:$0xff]  ;;  %v3133_v35 = vld [vmem:[#allocation13] sm:$0xff] }
 0x279   :  { %v4111_v32 = vld [vmem:[#allocation2 + $0x30] sm:$0xff] }
 0x27a   :  { %v3357_v36 = vpop.eup %3356  ;;  %v806_v37 = vmin.f32 %v772_v34, 0.0  ;;  %v928_v40 = vmul.f32 1.442695, %v900_v33  ;;  %vm790_vm10 = vcmp.gt.f32.partialorder %v772_v34, 0.0  ;;  %1254 = vmatpush.bf16.msrb.mxu0 %v3139_v28  ;;  %v3135_v33 = vld [vmem:[#allocation13 + $0x10] sm:$0xff] }
 0x27b   :  { %v2707_v38 = vadd.f32 -1.0, %v3357_v36  ;;  %v4114_v36 = vld [vmem:[#allocation2 + $0x38] sm:$0xff] }
 0x27c   :  { %v3359_v39 = vpop.eup %3358  ;;  %v836_v41 = vmul.f32 1.442695, %v806_v37 }
 0x27d   :  { %v963_v43 = vsel %vm883_vm8, %v867_v21, %v2707_v38  ;;  %v2693_v44 = vadd.f32 -1.0, %v3359_v39  ;;  %v3117_v21 = vld [vmem:[#allocation2] sm:$0xff] }
 0x27e   :  { %v3217_v45 = vpack.c.bf16 %v963_v43, %v962_v42  ;;  %3360 = vpow2.f32 %v836_v41  ;;  %1255 = vmatpush.bf16.msrb.mxu0 %v3138_v29 }
 0x27f   :  { %v869_v46 = vsel %vm789_vm9, %v769_v24, %v2693_v44  ;;  %v773_v47 = vpop.f32.mrf.mxu2  ;;  %3362 = vpow2.f32 %v928_v40  ;;  %v4102_v24 = vld [vmem:[#allocation2 + $0x18] sm:$0xff] }
 0x280   :  { %3233 = vst [vmem:[#allocation3 + $0x20] sm:$0xff] %v3217_v45   ;;  %v901_v48 = vmin.f32 %v869_v46, 0.0  ;;  %v774_v49 = vadd.f32 %v4084_v8, %v773_v47  ;;  %vm885_vm12 = vcmp.gt.f32.partialorder %v869_v46, 0.0 }
 0x282   :  { %v930_v50 = vmul.f32 1.442695, %v901_v48  ;;  %v807_v51 = vmin.f32 %v774_v49, 0.0  ;;  %vm791_vm13 = vcmp.gt.f32.partialorder %v774_v49, 0.0  ;;  %1256 = vmatpush.bf16.msrb.mxu0 %v3137_v30 }
 0x284   :  { %v3361_v52 = vpop.eup %3360  ;;  %3364 = vpow2.f32 %v930_v50  ;;  %v838_v53 = vmul.f32 1.442695, %v807_v51 }
 0x285   :  { %v2694_v54 = vadd.f32 -1.0, %v3361_v52  ;;  %v3363_v55 = vpop.eup %3362 }
 0x286   :  { %3366 = vpow2.f32 %v838_v53  ;;  %v2708_v58 = vadd.f32 -1.0, %v3363_v55  ;;  %v3148_v55 = vld [vmem:[#allocation14 + $0x38] sm:$0xff] }
 0x287   :  { %v870_v56 = vsel %vm790_vm10, %v772_v34, %v2694_v54  ;;  %v3130_v15 = vld [vmem:[#allocation3 + $0x20] sm:$0xff]  ;;  %v3134_v34 = vld [vmem:[#allocation13 + $0x8] sm:$0xff]  ;;  %1474 = vmatpush.bf16.msrb.mxu1 %v3148_v55 }
 0x288   :  { %v902_v57 = vmin.f32 %v870_v56, 0.0  ;;  %v964_v63 = vsel %vm884_vm11, %v868_v31, %v2708_v58  ;;  %vm886_vm14 = vcmp.gt.f32.partialorder %v870_v56, 0.0  ;;  %v3136_v31 = vld [vmem:[#allocation13 + $0x18] sm:$0xff] }
 0x289   :  { %1257 = vmatpush.bf16.msrb.mxu0 %v3136_v31 }
 0x28a   :  { %v3365_v59 = vpop.eup %3364  ;;  %v932_v62 = vmul.f32 1.442695, %v902_v57  ;;  %v3147_v57 = vld [vmem:[#allocation14 + $0x30] sm:$0xff] }
 0x28b   :  { %v2709_v60 = vadd.f32 -1.0, %v3365_v59  ;;  %1475 = vmatpush.bf16.msrb.mxu1 %v3147_v57 }
 0x28c   :  { %v3367_v61 = vpop.eup %3366  ;;  %3368 = vpow2.f32 %v932_v62 }
 0x28d   :  { %v965_v8 = vsel %vm885_vm12, %v869_v46, %v2709_v60  ;;  %v2695_v0 = vadd.f32 -1.0, %v3367_v61  ;;  %1258 = vmatpush.bf16.msrb.mxu0 %v3135_v33  ;;  %v3146_v60 = vld [vmem:[#allocation14 + $0x28] sm:$0xff]  ;;  %v3145_v61 = vld [vmem:[#allocation14 + $0x20] sm:$0xff] }
 0x28e   :  { %v3222_v1 = vpack.c.bf16 %v965_v8, %v964_v63  ;;  %v3144_v63 = vld [vmem:[#allocation14 + $0x18] sm:$0xff]  ;;  %v3143_v8 = vld [vmem:[#allocation14 + $0x10] sm:$0xff] }
 0x28f   :  { %v871_v2 = vsel %vm791_vm13, %v774_v49, %v2695_v0  ;;  %1476 = vmatpush.bf16.msrb.mxu1 %v3146_v60 }
 0x290   :  { %3234 = vst [vmem:[#allocation3 + $0x28] sm:$0xff] %v3222_v1   ;;  %v903_v3 = vmin.f32 %v871_v2, 0.0  ;;  %vm887_vm15 = vcmp.gt.f32.partialorder %v871_v2, 0.0 }
 0x291   :  { %1259 = vmatpush.bf16.msrb.mxu0 %v3134_v34 }
 0x292   :  { %v934_v4 = vmul.f32 1.442695, %v903_v3  ;;  %v3369_v5 = vpop.eup %3368  ;;  %v3141_v3 = vld [vmem:[#allocation14] sm:$0xff] }
 0x293   :  { %v2710_v6 = vadd.f32 -1.0, %v3369_v5  ;;  %1477 = vmatpush.bf16.msrb.mxu1 %v3145_v61 }
 0x294   :  { %3370 = vpow2.f32 %v934_v4  ;;  %v4120_v4 = vld [vmem:[%s4313_s8] ss:$0 sm:$0xff] }
 0x295   :  { %v966_v10 = vsel %vm886_vm14, %v870_v56, %v2710_v6  ;;  %1260 = vmatpush.bf16.msrb.mxu0 %v3133_v35 }
 0x297   :  { %v3131_v14 = vld [vmem:[#allocation3 + $0x28] sm:$0xff]  ;;  %1478 = vmatpush.bf16.msrb.mxu1 %v3144_v63 }
 0x29a   :  { %v3371_v7 = vpop.eup %3370 }
 0x29b   :  { %v2711_v9 = vadd.f32 -1.0, %v3371_v7  ;;  %1479 = vmatpush.bf16.msrb.mxu1 %v3143_v8 }
 0x29d   :  { %v967_v11 = vsel %vm887_vm15, %v871_v2, %v2711_v9  ;;  %v3142_v2 = vld [vmem:[#allocation14 + $0x8] sm:$0xff] }
 0x29e   :  { %v3227_v12 = vpack.c.bf16 %v967_v11, %v966_v10 }
 0x29f   :  { %1480 = vmatpush.bf16.msrb.mxu1 %v3142_v2 }
 0x2a0   :  { %3235 = vst [vmem:[#allocation3 + $0x38] sm:$0xff] %v3227_v12  }
 0x2a3   :  { %1481 = vmatpush.bf16.msrb.mxu1 %v3141_v3 }
 0x2a7   :  { %v3132_v13 = vld [vmem:[#allocation3 + $0x38] sm:$0xff] }
 0x2a8   :  { %1128 = vmatpush.bf16.msrb.mxu3 %v3132_v13 }
 0x2ac   :  { %1129 = vmatpush.bf16.msrb.mxu3 %v3131_v14 }
 0x2b0   :  { %1130 = vmatpush.bf16.msrb.mxu3 %v3130_v15 }
 0x2b4   :  { %1131 = vmatpush.bf16.msrb.mxu3 %v3129_v16 }
 0x2b8   :  { %1132 = vmatpush.bf16.msrb.mxu3 %v3128_v17 }
 0x2bc   :  { %1133 = vmatpush.bf16.msrb.mxu3 %v3127_v18 }
 0x2c0   :  { %1134 = vmatpush.bf16.msrb.mxu3 %v3126_v19 }
 0x2c4   :  { %1135 = vmatpush.bf16.msrb.mxu3 %v3125_v20 }
 0x2c7   :  { %1136 = vmatmul.bf16.vlgmr.msrb.gmra.mxu3 %v3117_v21 }
 0x2d7   :  { %1141 = vmatmul.bf16.gmra.mxu3 %v3118_v22 }
 0x2e7   :  { %1146 = vmatmul.bf16.gmra.mxu3 %v3119_v23 }
 0x2f7   :  { %1151 = vmatmul.bf16.gmra.mxu3 %v4102_v24 }
 0x307   :  { %1156 = vmatmul.bf16.gmra.mxu3 %v4105_v25 }
 0x317   :  { %1161 = vmatmul.bf16.gmra.mxu3 %v4108_v27 }
 0x327   :  { %1166 = vmatmul.bf16.gmra.mxu3 %v4111_v32 }
 0x337   :  { %1171 = vmatmul.bf16.gmra.mxu3 %v4114_v36 }
 0x34a   :  { %v1137_v37 = vpop.f32.mrf.mxu3 }
 0x352   :  { %v1139_v38 = vpop.f32.mrf.mxu3 }
 0x353   :  { %v1177_v39 = vpack.c.bf16 %v1139_v38, %v1137_v37 }
 0x355   :  { %1261 = vmatmul.bf16.vlgmr.msrb.gmra.mxu0 %v1177_v39 }
 0x35a   :  { %v1142_v40 = vpop.f32.mrf.mxu3 }
 0x362   :  { %v1144_v41 = vpop.f32.mrf.mxu3 }
 0x363   :  { %v1178_v42 = vpack.c.bf16 %v1144_v41, %v1142_v40 }
 0x365   :  { %1266 = vmatmul.bf16.gmra.mxu0 %v1178_v42 }
 0x36a   :  { %v1147_v43 = vpop.f32.mrf.mxu3 }
 0x372   :  { %v1149_v44 = vpop.f32.mrf.mxu3 }
 0x373   :  { %v1179_v45 = vpack.c.bf16 %v1149_v44, %v1147_v43 }
 0x375   :  { %1271 = vmatmul.bf16.gmra.mxu0 %v1179_v45 }
 0x37a   :  { %v1152_v46 = vpop.f32.mrf.mxu3 }
 0x382   :  { %v1154_v47 = vpop.f32.mrf.mxu3 }
 0x383   :  { %v1180_v48 = vpack.c.bf16 %v1154_v47, %v1152_v46 }
 0x385   :  { %1276 = vmatmul.bf16.gmra.mxu0 %v1180_v48 }
 0x38a   :  { %v1157_v49 = vpop.f32.mrf.mxu3 }
 0x392   :  { %v1159_v50 = vpop.f32.mrf.mxu3 }
 0x393   :  { %v1181_v51 = vpack.c.bf16 %v1159_v50, %v1157_v49 }
 0x395   :  { %1281 = vmatmul.bf16.gmra.mxu0 %v1181_v51 }
 0x39a   :  { %v1162_v52 = vpop.f32.mrf.mxu3 }
 0x3a2   :  { %v1164_v53 = vpop.f32.mrf.mxu3 }
 0x3a3   :  { %v1182_v54 = vpack.c.bf16 %v1164_v53, %v1162_v52 }
 0x3a5   :  { %1286 = vmatmul.bf16.gmra.mxu0 %v1182_v54 }
 0x3aa   :  { %v1167_v56 = vpop.f32.mrf.mxu3 }
 0x3b2   :  { %v1169_v58 = vpop.f32.mrf.mxu3 }
 0x3b3   :  { %v1183_v59 = vpack.c.bf16 %v1169_v58, %v1167_v56 }
 0x3b5   :  { %1291 = vmatmul.bf16.gmra.mxu0 %v1183_v59 }
 0x3ba   :  { %v1172_v62 = vpop.f32.mrf.mxu3 }
 0x3c2   :  { %v1174_v0 = vpop.f32.mrf.mxu3 }
 0x3c3   :  { %v1184_v1 = vpack.c.bf16 %v1174_v0, %v1172_v62 }
 0x3c5   :  { %1296 = vmatmul.bf16.gmra.mxu0 %v1184_v1 }
 0x3d2   :  { %v1262_v5 = vpop.f32.mrf.mxu0 }
 0x3d3   :  { %v1263_v6 = vadd.f32 %v4120_v4, %v1262_v5 }
 0x3d5   :  { %v1318_v7 = vmin.f32 %v1263_v6, 0.0  ;;  %vm1302_vm0 = vcmp.gt.f32.partialorder %v1263_v6, 0.0 }
 0x3d7   :  { %v1334_v9 = vmul.f32 1.442695, %v1318_v7 }
 0x3d9   :  { %3372 = vpow2.f32 %v1334_v9 }
 0x3da   :  { %v1264_v10 = vpop.f32.mrf.mxu0 }
 0x3db   :  { %v1265_v11 = vadd.f32 %v4120_v4, %v1264_v10 }
 0x3dd   :  { %v1319_v12 = vmin.f32 %v1265_v11, 0.0  ;;  %vm1303_vm1 = vcmp.gt.f32.partialorder %v1265_v11, 0.0 }
 0x3df   :  { %v1336_v13 = vmul.f32 1.442695, %v1319_v12  ;;  %v3373_v15 = vpop.eup %3372 }
 0x3e0   :  { %v2808_v18 = vadd.f32 -1.0, %v3373_v15 }
 0x3e1   :  { %3374 = vpow2.f32 %v1336_v13 }
 0x3e2   :  { %v1267_v14 = vpop.f32.mrf.mxu0  ;;  %v1382_v23 = vsel %vm1302_vm0, %v1263_v6, %v2808_v18 }
 0x3e3   :  { %v1268_v16 = vadd.f32 %v4120_v4, %v1267_v14 }
 0x3e5   :  { %v1320_v17 = vmin.f32 %v1268_v16, 0.0  ;;  %vm1304_vm2 = vcmp.gt.f32.partialorder %v1268_v16, 0.0 }
 0x3e7   :  { %v3375_v19 = vpop.eup %3374  ;;  %v1338_v21 = vmul.f32 1.442695, %v1320_v17 }
 0x3e8   :  { %v2809_v20 = vadd.f32 -1.0, %v3375_v19 }
 0x3e9   :  { %3376 = vpow2.f32 %v1338_v21 }
 0x3ea   :  { %v1269_v22 = vpop.f32.mrf.mxu0  ;;  %v1383_v26 = vsel %vm1303_vm1, %v1265_v11, %v2809_v20 }
 0x3eb   :  { %v1270_v28 = vadd.f32 %v4120_v4, %v1269_v22  ;;  %v1398_v29 = vpack.c.bf16 %v1383_v26, %v1382_v23 }
 0x3ed   :  { %v1321_v30 = vmin.f32 %v1270_v28, 0.0  ;;  %1482 = vmatmul.bf16.vlgmr.msrb.gmra.mxu1 %v1398_v29  ;;  %vm1305_vm3 = vcmp.gt.f32.partialorder %v1270_v28, 0.0 }
 0x3ef   :  { %v1340_v31 = vmul.f32 1.442695, %v1321_v30  ;;  %v3377_v34 = vpop.eup %3376 }
 0x3f0   :  { %v2810_v38 = vadd.f32 -1.0, %v3377_v34 }
 0x3f1   :  { %3378 = vpow2.f32 %v1340_v31 }
 0x3f2   :  { %v1272_v33 = vpop.f32.mrf.mxu0  ;;  %v1384_v43 = vsel %vm1304_vm2, %v1268_v16, %v2810_v38 }
 0x3f3   :  { %v1273_v35 = vadd.f32 %v4120_v4, %v1272_v33 }
 0x3f5   :  { %v1322_v37 = vmin.f32 %v1273_v35, 0.0  ;;  %vm1306_vm4 = vcmp.gt.f32.partialorder %v1273_v35, 0.0 }
 0x3f7   :  { %v3379_v39 = vpop.eup %3378  ;;  %v1342_v41 = vmul.f32 1.442695, %v1322_v37 }
 0x3f8   :  { %v2811_v40 = vadd.f32 -1.0, %v3379_v39 }
 0x3f9   :  { %3380 = vpow2.f32 %v1342_v41 }
 0x3fa   :  { %v1274_v42 = vpop.f32.mrf.mxu0  ;;  %v1385_v44 = vsel %vm1305_vm3, %v1270_v28, %v2811_v40 }
 0x3fb   :  { %v1275_v45 = vadd.f32 %v4120_v4, %v1274_v42  ;;  %v1399_v46 = vpack.c.bf16 %v1385_v44, %v1384_v43 }
 0x3fd   :  { %v1323_v47 = vmin.f32 %v1275_v45, 0.0  ;;  %1487 = vmatmul.bf16.gmra.mxu1 %v1399_v46  ;;  %vm1307_vm5 = vcmp.gt.f32.partialorder %v1275_v45, 0.0 }
 0x3ff   :  { %v1344_v48 = vmul.f32 1.442695, %v1323_v47  ;;  %v3381_v50 = vpop.eup %3380 }
 0x400   :  { %v2812_v53 = vadd.f32 -1.0, %v3381_v50 }
 0x401   :  { %3382 = vpow2.f32 %v1344_v48 }
 0x402   :  { %v1277_v49 = vpop.f32.mrf.mxu0  ;;  %v1386_v58 = vsel %vm1306_vm4, %v1273_v35, %v2812_v53 }
 0x403   :  { %v1278_v51 = vadd.f32 %v4120_v4, %v1277_v49 }
 0x405   :  { %v1324_v52 = vmin.f32 %v1278_v51, 0.0  ;;  %vm1308_vm6 = vcmp.gt.f32.partialorder %v1278_v51, 0.0 }
 0x407   :  { %v3383_v54 = vpop.eup %3382  ;;  %v1346_v56 = vmul.f32 1.442695, %v1324_v52 }
 0x408   :  { %v2813_v55 = vadd.f32 -1.0, %v3383_v54 }
 0x409   :  { %3384 = vpow2.f32 %v1346_v56 }
 0x40a   :  { %v1279_v57 = vpop.f32.mrf.mxu0  ;;  %v1387_v59 = vsel %vm1307_vm5, %v1275_v45, %v2813_v55 }
 0x40b   :  { %v1280_v60 = vadd.f32 %v4120_v4, %v1279_v57  ;;  %v1400_v61 = vpack.c.bf16 %v1387_v59, %v1386_v58 }
 0x40d   :  { %v1325_v62 = vmin.f32 %v1280_v60, 0.0  ;;  %1492 = vmatmul.bf16.gmra.mxu1 %v1400_v61  ;;  %vm1309_vm7 = vcmp.gt.f32.partialorder %v1280_v60, 0.0 }
 0x40f   :  { %v1348_v63 = vmul.f32 1.442695, %v1325_v62  ;;  %v3385_v0 = vpop.eup %3384 }
 0x410   :  { %v2814_v3 = vadd.f32 -1.0, %v3385_v0 }
 0x411   :  { %3386 = vpow2.f32 %v1348_v63 }
 0x412   :  { %v1282_v8 = vpop.f32.mrf.mxu0  ;;  %v1388_v10 = vsel %vm1308_vm6, %v1278_v51, %v2814_v3 }
 0x413   :  { %v1283_v1 = vadd.f32 %v4120_v4, %v1282_v8 }
 0x415   :  { %v1326_v2 = vmin.f32 %v1283_v1, 0.0  ;;  %vm1310_vm8 = vcmp.gt.f32.partialorder %v1283_v1, 0.0 }
 0x417   :  { %v3387_v5 = vpop.eup %3386  ;;  %v1350_v7 = vmul.f32 1.442695, %v1326_v2 }
 0x418   :  { %v2815_v6 = vadd.f32 -1.0, %v3387_v5 }
 0x419   :  { %3388 = vpow2.f32 %v1350_v7 }
 0x41a   :  { %v1284_v9 = vpop.f32.mrf.mxu0  ;;  %v1389_v11 = vsel %vm1309_vm7, %v1280_v60, %v2815_v6 }
 0x41b   :  { %v1285_v12 = vadd.f32 %v4120_v4, %v1284_v9  ;;  %v1401_v13 = vpack.c.bf16 %v1389_v11, %v1388_v10 }
 0x41d   :  { %v1327_v14 = vmin.f32 %v1285_v12, 0.0  ;;  %1497 = vmatmul.bf16.gmra.mxu1 %v1401_v13  ;;  %vm1311_vm9 = vcmp.gt.f32.partialorder %v1285_v12, 0.0 }
 0x41f   :  { %v1352_v15 = vmul.f32 1.442695, %v1327_v14  ;;  %v3389_v17 = vpop.eup %3388 }
 0x420   :  { %v2816_v20 = vadd.f32 -1.0, %v3389_v17 }
 0x421   :  { %3390 = vpow2.f32 %v1352_v15 }
 0x422   :  { %v1287_v16 = vpop.f32.mrf.mxu0  ;;  %v1390_v28 = vsel %vm1310_vm8, %v1283_v1, %v2816_v20 }
 0x423   :  { %v1288_v18 = vadd.f32 %v4120_v4, %v1287_v16 }
 0x425   :  { %v1328_v19 = vmin.f32 %v1288_v18, 0.0  ;;  %vm1312_vm10 = vcmp.gt.f32.partialorder %v1288_v18, 0.0 }
 0x427   :  { %v3391_v21 = vpop.eup %3390  ;;  %v1354_v23 = vmul.f32 1.442695, %v1328_v19 }
 0x428   :  { %v2817_v22 = vadd.f32 -1.0, %v3391_v21 }
 0x429   :  { %3392 = vpow2.f32 %v1354_v23 }
 0x42a   :  { %v1289_v26 = vpop.f32.mrf.mxu0  ;;  %v1391_v29 = vsel %vm1311_vm9, %v1285_v12, %v2817_v22 }
 0x42b   :  { %v1290_v30 = vadd.f32 %v4120_v4, %v1289_v26  ;;  %v1402_v31 = vpack.c.bf16 %v1391_v29, %v1390_v28 }
 0x42d   :  { %v1329_v33 = vmin.f32 %v1290_v30, 0.0  ;;  %1502 = vmatmul.bf16.gmra.mxu1 %v1402_v31  ;;  %vm1313_vm11 = vcmp.gt.f32.partialorder %v1290_v30, 0.0 }
 0x42f   :  { %v1356_v34 = vmul.f32 1.442695, %v1329_v33  ;;  %v3393_v37 = vpop.eup %3392 }
 0x430   :  { %v2818_v40 = vadd.f32 -1.0, %v3393_v37 }
 0x431   :  { %3394 = vpow2.f32 %v1356_v34 }
 0x432   :  { %v1292_v35 = vpop.f32.mrf.mxu0  ;;  %v1392_v45 = vsel %vm1312_vm10, %v1288_v18, %v2818_v40 }
 0x433   :  { %v1293_v38 = vadd.f32 %v4120_v4, %v1292_v35 }
 0x435   :  { %v1330_v39 = vmin.f32 %v1293_v38, 0.0  ;;  %vm1314_vm12 = vcmp.gt.f32.partialorder %v1293_v38, 0.0 }
 0x437   :  { %v3395_v41 = vpop.eup %3394  ;;  %v1358_v43 = vmul.f32 1.442695, %v1330_v39 }
 0x438   :  { %v2819_v42 = vadd.f32 -1.0, %v3395_v41 }
 0x439   :  { %3396 = vpow2.f32 %v1358_v43 }
 0x43a   :  { %v1294_v44 = vpop.f32.mrf.mxu0  ;;  %v1393_v46 = vsel %vm1313_vm11, %v1290_v30, %v2819_v42 }
 0x43b   :  { %v1295_v47 = vadd.f32 %v4120_v4, %v1294_v44  ;;  %v1403_v48 = vpack.c.bf16 %v1393_v46, %v1392_v45 }
 0x43d   :  { %v1331_v49 = vmin.f32 %v1295_v47, 0.0  ;;  %1507 = vmatmul.bf16.gmra.mxu1 %v1403_v48  ;;  %vm1315_vm13 = vcmp.gt.f32.partialorder %v1295_v47, 0.0 }
 0x43f   :  { %v1360_v50 = vmul.f32 1.442695, %v1331_v49  ;;  %v3397_v52 = vpop.eup %3396 }
 0x440   :  { %v2820_v55 = vadd.f32 -1.0, %v3397_v52 }
 0x441   :  { %3398 = vpow2.f32 %v1360_v50 }
 0x442   :  { %v1297_v51 = vpop.f32.mrf.mxu0  ;;  %v1394_v60 = vsel %vm1314_vm12, %v1293_v38, %v2820_v55 }
 0x443   :  { %v1298_v53 = vadd.f32 %v4120_v4, %v1297_v51 }
 0x445   :  { %v1332_v54 = vmin.f32 %v1298_v53, 0.0  ;;  %vm1316_vm14 = vcmp.gt.f32.partialorder %v1298_v53, 0.0 }
 0x447   :  { %v3399_v56 = vpop.eup %3398  ;;  %v1362_v58 = vmul.f32 1.442695, %v1332_v54 }
 0x448   :  { %v2821_v57 = vadd.f32 -1.0, %v3399_v56 }
 0x449   :  { %3400 = vpow2.f32 %v1362_v58 }
 0x44a   :  { %v1299_v59 = vpop.f32.mrf.mxu0  ;;  %v1395_v61 = vsel %vm1315_vm13, %v1295_v47, %v2821_v57 }
 0x44b   :  { %v1300_v62 = vadd.f32 %v4120_v4, %v1299_v59  ;;  %v1404_v63 = vpack.c.bf16 %v1395_v61, %v1394_v60  ;;  %v4141_v4 = vld [vmem:[%s4315_s10] ss:$0 sm:$0xff] }
 0x44d   :  { %v1333_v8 = vmin.f32 %v1300_v62, 0.0  ;;  %1512 = vmatmul.bf16.gmra.mxu1 %v1404_v63  ;;  %vm1317_vm15 = vcmp.gt.f32.partialorder %v1300_v62, 0.0 }
 0x44f   :  { %v1364_v0 = vmul.f32 1.442695, %v1333_v8  ;;  %v3401_v1 = vpop.eup %3400 }
 0x450   :  { %v2822_v2 = vadd.f32 -1.0, %v3401_v1 }
 0x451   :  { %3402 = vpow2.f32 %v1364_v0 }
 0x452   :  { %v1396_v6 = vsel %vm1316_vm14, %v1298_v53, %v2822_v2 }
 0x457   :  { %v3403_v3 = vpop.eup %3402 }
 0x458   :  { %v2823_v5 = vadd.f32 -1.0, %v3403_v3 }
 0x45a   :  { %v1397_v7 = vsel %vm1317_vm15, %v1300_v62, %v2823_v5 }
 0x45b   :  { %v1405_v9 = vpack.c.bf16 %v1397_v7, %v1396_v6 }
 0x45d   :  { %1517 = vmatmul.bf16.gmra.mxu1 %v1405_v9 }
 0x46a   :  { %v1483_v10 = vpop.f32.mrf.mxu1 }
 0x46b   :  { %v1484_v11 = vadd.f32 %v4141_v4, %v1483_v10 }
 0x46d   :  { %v1539_v12 = vmin.f32 %v1484_v11, 0.0  ;;  %vm1523_vm0 = vcmp.gt.f32.partialorder %v1484_v11, 0.0 }
 0x46f   :  { %v1555_v13 = vmul.f32 1.442695, %v1539_v12 }
 0x471   :  { %3404 = vpow2.f32 %v1555_v13 }
 0x472   :  { %v1485_v14 = vpop.f32.mrf.mxu1 }
 0x473   :  { %v1486_v15 = vadd.f32 %v4141_v4, %v1485_v14 }
 0x475   :  { %v1540_v16 = vmin.f32 %v1486_v15, 0.0  ;;  %vm1524_vm1 = vcmp.gt.f32.partialorder %v1486_v15, 0.0 }
 0x477   :  { %v3405_v17 = vpop.eup %3404  ;;  %v1557_v18 = vmul.f32 1.442695, %v1540_v16 }
 0x478   :  { %v2856_v19 = vadd.f32 -1.0, %v3405_v17 }
 0x479   :  { %3406 = vpow2.f32 %v1557_v18 }
 0x47a   :  { %v1603_v20 = vsel %vm1523_vm0, %v1484_v11, %v2856_v19  ;;  %v1488_v21 = vpop.f32.mrf.mxu1 }
 0x47b   :  { %v1635_v22 = vmin.f32 %v1603_v20, 0.0  ;;  %v1489_v23 = vadd.f32 %v4141_v4, %v1488_v21  ;;  %vm1619_vm3 = vcmp.gt.f32.partialorder %v1603_v20, 0.0 }
 0x47d   :  { %v1541_v26 = vmin.f32 %v1489_v23, 0.0  ;;  %v1651_v29 = vmul.f32 1.442695, %v1635_v22  ;;  %vm1525_vm2 = vcmp.gt.f32.partialorder %v1489_v23, 0.0 }
 0x47f   :  { %v3407_v28 = vpop.eup %3406  ;;  %v1559_v30 = vmul.f32 1.442695, %v1541_v26 }
 0x480   :  { %v2857_v31 = vadd.f32 -1.0, %v3407_v28 }
 0x481   :  { %3408 = vpow2.f32 %v1559_v30 }
 0x482   :  { %v1604_v33 = vsel %vm1524_vm1, %v1486_v15, %v2857_v31  ;;  %v1490_v34 = vpop.f32.mrf.mxu1  ;;  %3410 = vpow2.f32 %v1651_v29 }
 0x483   :  { %v1636_v35 = vmin.f32 %v1604_v33, 0.0  ;;  %v1491_v37 = vadd.f32 %v4141_v4, %v1490_v34  ;;  %vm1620_vm4 = vcmp.gt.f32.partialorder %v1604_v33, 0.0 }
 0x485   :  { %v1653_v38 = vmul.f32 1.442695, %v1636_v35  ;;  %v1542_v39 = vmin.f32 %v1491_v37, 0.0  ;;  %vm1526_vm5 = vcmp.gt.f32.partialorder %v1491_v37, 0.0 }
 0x487   :  { %v3409_v40 = vpop.eup %3408  ;;  %3412 = vpow2.f32 %v1653_v38  ;;  %v1561_v41 = vmul.f32 1.442695, %v1542_v39 }
 0x488   :  { %v2858_v42 = vadd.f32 -1.0, %v3409_v40  ;;  %v3411_v43 = vpop.eup %3410 }
 0x489   :  { %3414 = vpow2.f32 %v1561_v41  ;;  %v2872_v48 = vadd.f32 -1.0, %v3411_v43 }
 0x48a   :  { %v1605_v44 = vsel %vm1525_vm2, %v1489_v23, %v2858_v42  ;;  %v1493_v45 = vpop.f32.mrf.mxu1 }
 0x48b   :  { %v1637_v46 = vmin.f32 %v1605_v44, 0.0  ;;  %v1494_v47 = vadd.f32 %v4141_v4, %v1493_v45  ;;  %v4148_v56 = vsel %vm1619_vm3, %v1603_v20, %v2872_v48  ;;  %vm1621_vm7 = vcmp.gt.f32.partialorder %v1605_v44, 0.0 }
 0x48d   :  { %v3413_v49 = vpop.eup %3412  ;;  %v1543_v50 = vmin.f32 %v1494_v47, 0.0  ;;  %v1655_v53 = vmul.f32 1.442695, %v1637_v46  ;;  %vm1527_vm6 = vcmp.gt.f32.partialorder %v1494_v47, 0.0 }
 0x48e   :  { %v2873_v51 = vadd.f32 -1.0, %v3413_v49 }
 0x48f   :  { %v3415_v52 = vpop.eup %3414  ;;  %v1563_v54 = vmul.f32 1.442695, %v1543_v50 }
 0x490   :  { %v2859_v55 = vadd.f32 -1.0, %v3415_v52  ;;  %v4150_v57 = vsel %vm1620_vm4, %v1604_v33, %v2873_v51 }
 0x491   :  { %3416 = vpow2.f32 %v1563_v54  ;;  %v1715_v58 = vpack.c.bf16 %v4150_v57, %v4148_v56  ;;  %v3153_v56 = vld [vmem:[#allocation16 + $0x20] sm:$0xff]  ;;  %v3152_v57 = vld [vmem:[#allocation16 + $0x18] sm:$0xff] }
 0x492   :  { %v1606_v59 = vsel %vm1526_vm5, %v1491_v37, %v2859_v55  ;;  %v1495_v60 = vpop.f32.mrf.mxu1  ;;  %3418 = vpow2.f32 %v1655_v53 }
 0x493   :  { %v1638_v61 = vmin.f32 %v1606_v59, 0.0  ;;  %v1496_v62 = vadd.f32 %v4141_v4, %v1495_v60  ;;  %vm1622_vm8 = vcmp.gt.f32.partialorder %v1606_v59, 0.0 }
 0x495   :  { %v1657_v63 = vmul.f32 1.442695, %v1638_v61  ;;  %v1544_v8 = vmin.f32 %v1496_v62, 0.0  ;;  %vm1528_vm9 = vcmp.gt.f32.partialorder %v1496_v62, 0.0 }
 0x497   :  { %v3417_v0 = vpop.eup %3416  ;;  %3420 = vpow2.f32 %v1657_v63  ;;  %v1565_v1 = vmul.f32 1.442695, %v1544_v8 }
 0x498   :  { %v2860_v2 = vadd.f32 -1.0, %v3417_v0  ;;  %v3419_v3 = vpop.eup %3418 }
 0x499   :  { %3422 = vpow2.f32 %v1565_v1  ;;  %v2874_v10 = vadd.f32 -1.0, %v3419_v3 }
 0x49a   :  { %v1607_v5 = vsel %vm1527_vm6, %v1494_v47, %v2860_v2  ;;  %v1498_v6 = vpop.f32.mrf.mxu1 }
 0x49b   :  { %v1639_v7 = vmin.f32 %v1607_v5, 0.0  ;;  %v1499_v9 = vadd.f32 %v4141_v4, %v1498_v6  ;;  %v4156_v18 = vsel %vm1621_vm7, %v1605_v44, %v2874_v10  ;;  %vm1623_vm11 = vcmp.gt.f32.partialorder %v1607_v5, 0.0 }
 0x49d   :  { %v3421_v11 = vpop.eup %3420  ;;  %v1545_v12 = vmin.f32 %v1499_v9, 0.0  ;;  %v1659_v15 = vmul.f32 1.442695, %v1639_v7  ;;  %vm1529_vm10 = vcmp.gt.f32.partialorder %v1499_v9, 0.0 }
 0x49e   :  { %v2875_v13 = vadd.f32 -1.0, %v3421_v11 }
 0x49f   :  { %v3423_v14 = vpop.eup %3422  ;;  %v1567_v16 = vmul.f32 1.442695, %v1545_v12 }
 0x4a0   :  { %v2861_v17 = vadd.f32 -1.0, %v3423_v14  ;;  %v4158_v19 = vsel %vm1622_vm8, %v1606_v59, %v2875_v13 }
 0x4a1   :  { %3424 = vpow2.f32 %v1567_v16  ;;  %v1716_v20 = vpack.c.bf16 %v4158_v19, %v4156_v18  ;;  %v3155_v18 = vld [vmem:[#allocation16 + $0x30] sm:$0xff]  ;;  %v3154_v19 = vld [vmem:[#allocation16 + $0x28] sm:$0xff] }
 0x4a2   :  { %v1608_v21 = vsel %vm1528_vm9, %v1496_v62, %v2861_v17  ;;  %v1500_v22 = vpop.f32.mrf.mxu1  ;;  %3426 = vpow2.f32 %v1659_v15 }
 0x4a3   :  { %v1640_v23 = vmin.f32 %v1608_v21, 0.0  ;;  %v1501_v26 = vadd.f32 %v4141_v4, %v1500_v22  ;;  %vm1624_vm12 = vcmp.gt.f32.partialorder %v1608_v21, 0.0 }
 0x4a5   :  { %v1661_v28 = vmul.f32 1.442695, %v1640_v23  ;;  %v1546_v29 = vmin.f32 %v1501_v26, 0.0  ;;  %vm1530_vm13 = vcmp.gt.f32.partialorder %v1501_v26, 0.0 }
 0x4a7   :  { %v3425_v30 = vpop.eup %3424  ;;  %3428 = vpow2.f32 %v1661_v28  ;;  %v1569_v31 = vmul.f32 1.442695, %v1546_v29 }
 0x4a8   :  { %v2862_v33 = vadd.f32 -1.0, %v3425_v30  ;;  %v3427_v34 = vpop.eup %3426 }
 0x4a9   :  { %3430 = vpow2.f32 %v1569_v31  ;;  %v2876_v39 = vadd.f32 -1.0, %v3427_v34 }
 0x4aa   :  { %v1609_v35 = vsel %vm1529_vm10, %v1499_v9, %v2862_v33  ;;  %v1503_v37 = vpop.f32.mrf.mxu1 }
 0x4ab   :  { %v1641_v38 = vmin.f32 %v1609_v35, 0.0  ;;  %v4163_v45 = vsel %vm1623_vm11, %v1607_v5, %v2876_v39  ;;  %vm1625_vm14 = vcmp.gt.f32.partialorder %v1609_v35, 0.0  ;;  %v4181_v14 = vadd.f32 %v4141_v4, %v1503_v37 }
 0x4ad   :  { %v3429_v40 = vpop.eup %3428  ;;  %v1663_v43 = vmul.f32 1.442695, %v1641_v38  ;;  %v1547_v23 = vmin.f32 %v4181_v14, 0.0  ;;  %vm1531_vm7 = vcmp.gt.f32.partialorder %v4181_v14, 0.0 }
 0x4ae   :  { %v2877_v41 = vadd.f32 -1.0, %v3429_v40 }
 0x4af   :  { %v3431_v42 = vpop.eup %3430  ;;  %3432 = vpow2.f32 %v1663_v43  ;;  %v1571_v33 = vmul.f32 1.442695, %v1547_v23 }
 0x4b0   :  { %v2863_v44 = vadd.f32 -1.0, %v3431_v42  ;;  %v4165_v46 = vsel %vm1624_vm12, %v1608_v21, %v2877_v41 }
 0x4b1   :  { %v1717_v47 = vpack.c.bf16 %v4165_v46, %v4163_v45  ;;  %v3156_v45 = vld [vmem:[#allocation16 + $0x38] sm:$0xff] }
 0x4b2   :  { %v1610_v48 = vsel %vm1530_vm13, %v1501_v26, %v2863_v44  ;;  %v1505_v49 = vpop.f32.mrf.mxu1  ;;  %1848 = vmatpush.bf16.msra.mxu3 %v3156_v45 }
 0x4b3   :  { %v1642_v50 = vmin.f32 %v1610_v48, 0.0  ;;  %vm1626_vm15 = vcmp.gt.f32.partialorder %v1610_v48, 0.0  ;;  %v1506_v10 = vadd.f32 %v4141_v4, %v1505_v49 }
 0x4b5   :  { %v1665_v51 = vmul.f32 1.442695, %v1642_v50  ;;  %v3433_v52 = vpop.eup %3432  ;;  %v1548_v21 = vmin.f32 %v1506_v10, 0.0  ;;  %vm1532_vm5 = vcmp.gt.f32.partialorder %v1506_v10, 0.0 }
 0x4b6   :  { %v2878_v54 = vadd.f32 -1.0, %v3433_v52  ;;  %1849 = vmatpush.bf16.msra.mxu3 %v3155_v18 }
 0x4b7   :  { %3434 = vpow2.f32 %v1665_v51  ;;  %v1573_v29 = vmul.f32 1.442695, %v1548_v21 }
 0x4b8   :  { %v4169_v60 = vsel %vm1625_vm14, %v1609_v35, %v2878_v54 }
 0x4ba   :  { %v1508_v53 = vpop.f32.mrf.mxu1  ;;  %1850 = vmatpush.bf16.msra.mxu3 %v3154_v19 }
 0x4bb   :  { %v1509_v7 = vadd.f32 %v4141_v4, %v1508_v53 }
 0x4bd   :  { %v3435_v55 = vpop.eup %3434  ;;  %v1549_v15 = vmin.f32 %v1509_v7, 0.0  ;;  %vm1533_vm4 = vcmp.gt.f32.partialorder %v1509_v7, 0.0 }
 0x4be   :  { %v2879_v59 = vadd.f32 -1.0, %v3435_v55  ;;  %1851 = vmatpush.bf16.msra.mxu3 %v3153_v56 }
 0x4bf   :  { %v1575_v26 = vmul.f32 1.442695, %v1549_v15 }
 0x4c0   :  { %v4171_v61 = vsel %vm1626_vm15, %v1610_v48, %v2879_v59 }
 0x4c1   :  { %v1718_v62 = vpack.c.bf16 %v4171_v61, %v4169_v60 }
 0x4c2   :  { %v1510_v63 = vpop.f32.mrf.mxu1  ;;  %1852 = vmatpush.bf16.msra.mxu3 %v3152_v57 }
 0x4c3   :  { %v1511_v3 = vadd.f32 %v4141_v4, %v1510_v63 }
 0x4c5   :  { %v1550_v9 = vmin.f32 %v1511_v3, 0.0  ;;  %vm1534_vm3 = vcmp.gt.f32.partialorder %v1511_v3, 0.0 }
 0x4c7   :  { %v1577_v17 = vmul.f32 1.442695, %v1550_v9 }
 0x4ca   :  { %v1513_v8 = vpop.f32.mrf.mxu1 }
 0x4cb   :  { %v1514_v0 = vadd.f32 %v4141_v4, %v1513_v8 }
 0x4cd   :  { %v1551_v6 = vmin.f32 %v1514_v0, 0.0  ;;  %vm1535_vm2 = vcmp.gt.f32.partialorder %v1514_v0, 0.0 }
 0x4cf   :  { %v1579_v12 = vmul.f32 1.442695, %v1551_v6 }
 0x4d2   :  { %v1515_v1 = vpop.f32.mrf.mxu1 }
 0x4d3   :  { %v1516_v2 = vadd.f32 %v4141_v4, %v1515_v1 }
 0x4d5   :  { %v1552_v5 = vmin.f32 %v1516_v2, 0.0  ;;  %vm1536_vm0 = vcmp.gt.f32.partialorder %v1516_v2, 0.0 }
 0x4d7   :  { %v1581_v11 = vmul.f32 1.442695, %v1552_v5 }
 0x4d9   :  { %3436 = vpow2.f32 %v1581_v11 }
 0x4da   :  { %v1518_v13 = vpop.f32.mrf.mxu1  ;;  %3438 = vpow2.f32 %v1579_v12 }
 0x4db   :  { %v1519_v16 = vadd.f32 %v4141_v4, %v1518_v13  ;;  %3440 = vpow2.f32 %v1577_v17 }
 0x4dd   :  { %v1553_v22 = vmin.f32 %v1519_v16, 0.0  ;;  %vm1537_vm1 = vcmp.gt.f32.partialorder %v1519_v16, 0.0 }
 0x4df   :  { %v1583_v28 = vmul.f32 1.442695, %v1553_v22  ;;  %v3437_v31 = vpop.eup %3436 }
 0x4e0   :  { %v3439_v35 = vpop.eup %3438  ;;  %v2869_v39 = vadd.f32 -1.0, %v3437_v31 }
 0x4e1   :  { %3442 = vpow2.f32 %v1583_v28  ;;  %v3441_v38 = vpop.eup %3440  ;;  %v2868_v41 = vadd.f32 -1.0, %v3439_v35 }
 0x4e2   :  { %v1520_v30 = vpop.f32.mrf.mxu1  ;;  %3444 = vpow2.f32 %v1575_v26  ;;  %v2867_v48 = vadd.f32 -1.0, %v3441_v38  ;;  %v1616_v49 = vsel %vm1536_vm0, %v1516_v2, %v2869_v39 }
 0x4e3   :  { %v1521_v34 = vadd.f32 %v4141_v4, %v1520_v30  ;;  %3446 = vpow2.f32 %v1573_v29  ;;  %v4186_v4 = vsel %vm1535_vm2, %v1514_v0, %v2868_v41  ;;  %v1648_v55 = vmin.f32 %v1616_v49, 0.0 }
 0x4e4   :  { %3448 = vpow2.f32 %v1571_v33  ;;  %v1614_v63 = vsel %vm1534_vm3, %v1511_v3, %v2867_v48  ;;  %v1647_v8 = vmin.f32 %v4186_v4, 0.0  ;;  %vm1632_vm10 = vcmp.gt.f32.partialorder %v1616_v49, 0.0 }
 0x4e5   :  { %v1554_v37 = vmin.f32 %v1521_v34, 0.0  ;;  %v1646_v2 = vmin.f32 %v1614_v63, 0.0  ;;  %v1677_v12 = vmul.f32 1.442695, %v1648_v55  ;;  %vm1538_vm6 = vcmp.gt.f32.partialorder %v1521_v34, 0.0 }
 0x4e6   :  { %v1675_v13 = vmul.f32 1.442695, %v1647_v8  ;;  %vm1631_vm11 = vcmp.gt.f32.partialorder %v4186_v4, 0.0  ;;  %vm1630_vm12 = vcmp.gt.f32.partialorder %v1614_v63, 0.0 }
 0x4e7   :  { %v3443_v40 = vpop.eup %3442  ;;  %v1585_v42 = vmul.f32 1.442695, %v1554_v37  ;;  %v1673_v22 = vmul.f32 1.442695, %v1646_v2 }
 0x4e8   :  { %v2870_v43 = vadd.f32 -1.0, %v3443_v40  ;;  %v3445_v44 = vpop.eup %3444 }
 0x4e9   :  { %3450 = vpow2.f32 %v1585_v42  ;;  %v3447_v51 = vpop.eup %3446  ;;  %v2866_v53 = vadd.f32 -1.0, %v3445_v44 }
 0x4ea   :  { %v1617_v50 = vsel %vm1537_vm1, %v1519_v16, %v2870_v43  ;;  %v3449_v54 = vpop.eup %3448  ;;  %v2865_v59 = vadd.f32 -1.0, %v3447_v51 }
 0x4eb   :  { %v1649_v52 = vmin.f32 %v1617_v50, 0.0  ;;  %v2864_v6 = vadd.f32 -1.0, %v3449_v54  ;;  %v1613_v9 = vsel %vm1533_vm4, %v1509_v7, %v2866_v53  ;;  %vm1633_vm8 = vcmp.gt.f32.partialorder %v1617_v50, 0.0 }
 0x4ec   :  { %v1612_v0 = vsel %vm1532_vm5, %v1506_v10, %v2865_v59  ;;  %v1645_v16 = vmin.f32 %v1613_v9, 0.0  ;;  %vm1629_vm13 = vcmp.gt.f32.partialorder %v1613_v9, 0.0 }
 0x4ed   :  { %v1679_v5 = vmul.f32 1.442695, %v1649_v52  ;;  %v1611_v17 = vsel %vm1531_vm7, %v4181_v14, %v2864_v6  ;;  %v1644_v21 = vmin.f32 %v1612_v0, 0.0  ;;  %vm1628_vm14 = vcmp.gt.f32.partialorder %v1612_v0, 0.0 }
 0x4ee   :  { %v1643_v7 = vmin.f32 %v1611_v17, 0.0  ;;  %v1671_v26 = vmul.f32 1.442695, %v1645_v16  ;;  %vm1627_vm15 = vcmp.gt.f32.partialorder %v1611_v17, 0.0 }
 0x4ef   :  { %v3451_v1 = vpop.eup %3450  ;;  %3452 = vpow2.f32 %v1679_v5  ;;  %v1669_v29 = vmul.f32 1.442695, %v1644_v21  ;;  %v3164_v21 = vld [vmem:[#allocation17 + $0x38] sm:$0xff] }
 0x4f0   :  { %v2871_v11 = vadd.f32 -1.0, %v3451_v1  ;;  %3454 = vpow2.f32 %v1677_v12  ;;  %v1667_v30 = vmul.f32 1.442695, %v1643_v7  ;;  %2069 = vmatpush.bf16.msra.mxu0 %v3164_v21 }
 0x4f1   :  { %3456 = vpow2.f32 %v1675_v13 }
 0x4f2   :  { %v1618_v15 = vsel %vm1538_vm6, %v1521_v34, %v2871_v11 }
 0x4f3   :  { %v1650_v3 = vmin.f32 %v1618_v15, 0.0  ;;  %vm1634_vm9 = vcmp.gt.f32.partialorder %v1618_v15, 0.0 }
 0x4f5   :  { %v1681_v23 = vmul.f32 1.442695, %v1650_v3  ;;  %v3453_v28 = vpop.eup %3452 }
 0x4f6   :  { %v3455_v10 = vpop.eup %3454  ;;  %v2886_v33 = vadd.f32 -1.0, %v3453_v28 }
 0x4f7   :  { %3458 = vpow2.f32 %v1681_v23  ;;  %v3457_v31 = vpop.eup %3456  ;;  %v2885_v14 = vadd.f32 -1.0, %v3455_v10  ;;  %v3161_v10 = vld [vmem:[#allocation17 + $0x20] sm:$0xff] }
 0x4f8   :  { %3460 = vpow2.f32 %v1673_v22  ;;  %v1713_v38 = vsel %vm1633_vm8, %v1617_v50, %v2886_v33  ;;  %v2884_v40 = vadd.f32 -1.0, %v3457_v31  ;;  %v3160_v31 = vld [vmem:[#allocation17 + $0x18] sm:$0xff] }
 0x4f9   :  { %3462 = vpow2.f32 %v1671_v26  ;;  %v1712_v43 = vsel %vm1632_vm10, %v1616_v49, %v2885_v14  ;;  %v3163_v26 = vld [vmem:[#allocation17 + $0x30] sm:$0xff]  ;;  %v3157_v14 = vld [vmem:[#allocation17] sm:$0xff] }
 0x4fa   :  { %3464 = vpow2.f32 %v1669_v29  ;;  %v1711_v51 = vsel %vm1631_vm11, %v4186_v4, %v2884_v40  ;;  %v3538_v4 = vld [vmem:[#allocation2] sm:$0xff]  ;;  %2070 = vmatpush.bf16.msra.mxu0 %v3163_v26  ;;  %v3162_v29 = vld [vmem:[#allocation17 + $0x28] sm:$0xff] }
 0x4fb   :  { %3466 = vpow2.f32 %v1667_v30  ;;  %v1721_v54 = vpack.c.bf16 %v1712_v43, %v1711_v51 }
 0x4fd   :  { %v3459_v34 = vpop.eup %3458 }
 0x4fe   :  { %v2887_v35 = vadd.f32 -1.0, %v3459_v34  ;;  %v3461_v37 = vpop.eup %3460  ;;  %2071 = vmatpush.bf16.msra.mxu0 %v3162_v29  ;;  %v3159_v34 = vld [vmem:[#allocation17 + $0x10] sm:$0xff] }
 0x4ff   :  { %v3463_v41 = vpop.eup %3462  ;;  %v2883_v44 = vadd.f32 -1.0, %v3461_v37  ;;  %v4213_v37 = vld [vmem:[%s4317_s12] ss:$0 sm:$0xff] }
 0x500   :  { %v1714_v39 = vsel %vm1634_vm9, %v1618_v15, %v2887_v35  ;;  %v3465_v48 = vpop.eup %3464  ;;  %v2882_v52 = vadd.f32 -1.0, %v3463_v41  ;;  %v3158_v35 = vld [vmem:[#allocation17 + $0x8] sm:$0xff] }
 0x501   :  { %v1722_v42 = vpack.c.bf16 %v1714_v39, %v1713_v38  ;;  %v3467_v53 = vpop.eup %3466  ;;  %v1710_v55 = vsel %vm1630_vm12, %v1614_v63, %v2883_v44  ;;  %v2881_v59 = vadd.f32 -1.0, %v3465_v48  ;;  %v3539_v63 = vld [vmem:[#allocation2 + $0x8] sm:$0xff] }
 0x502   :  { %v1709_v50 = vsel %vm1629_vm13, %v1613_v9, %v2882_v52  ;;  %v2880_v8 = vadd.f32 -1.0, %v3467_v53  ;;  %v3540_v9 = vld [vmem:[#allocation2 + $0x10] sm:$0xff]  ;;  %2072 = vmatpush.bf16.msra.mxu0 %v3161_v10 }
 0x503   :  { %1723 = vmatpush.bf16.msra.mxu2 %v1722_v42  ;;  %v1720_v1 = vpack.c.bf16 %v1710_v55, %v1709_v50  ;;  %v1708_v49 = vsel %vm1628_vm14, %v1612_v0, %v2881_v59 }
 0x504   :  { %v1707_v5 = vsel %vm1627_vm15, %v1611_v17, %v2880_v8 }
 0x505   :  { %v1719_v6 = vpack.c.bf16 %v1708_v49, %v1707_v5 }
 0x506   :  { %2073 = vmatpush.bf16.msra.mxu0 %v3160_v31 }
 0x507   :  { %1724 = vmatpush.bf16.msra.mxu2 %v1721_v54 }
 0x50a   :  { %2074 = vmatpush.bf16.msra.mxu0 %v3159_v34 }
 0x50b   :  { %1725 = vmatpush.bf16.msra.mxu2 %v1720_v1 }
 0x50e   :  { %2075 = vmatpush.bf16.msra.mxu0 %v3158_v35 }
 0x50f   :  { %1726 = vmatpush.bf16.msra.mxu2 %v1719_v6 }
 0x512   :  { %2076 = vmatpush.bf16.msra.mxu0 %v3157_v14 }
 0x513   :  { %1727 = vmatpush.bf16.msra.mxu2 %v1718_v62 }
 0x517   :  { %1728 = vmatpush.bf16.msra.mxu2 %v1717_v47 }
 0x51b   :  { %1729 = vmatpush.bf16.msra.mxu2 %v1716_v20  ;;  %v3150_v20 = vld [vmem:[#allocation16 + $0x8] sm:$0xff] }
 0x51f   :  { %1730 = vmatpush.bf16.msra.mxu2 %v1715_v58  ;;  %v3151_v58 = vld [vmem:[#allocation16 + $0x10] sm:$0xff] }
 0x520   :  { %1853 = vmatpush.bf16.msra.mxu3 %v3151_v58 }
 0x522   :  { %1731 = vmatmul.bf16.vlgmr.msra.gmra.mxu2 %v3538_v4 }
 0x524   :  { %1854 = vmatpush.bf16.msra.mxu3 %v3150_v20 }
 0x532   :  { %1736 = vmatmul.bf16.gmra.mxu2 %v3539_v63 }
 0x542   :  { %1741 = vmatmul.bf16.gmra.mxu2 %v3540_v9 }
 0x552   :  { %1746 = vmatmul.bf16.gmra.mxu2 %v4102_v24  ;;  %v3149_v24 = vld [vmem:[#allocation16] sm:$0xff] }
 0x553   :  { %1855 = vmatpush.bf16.msra.mxu3 %v3149_v24 }
 0x562   :  { %1751 = vmatmul.bf16.gmra.mxu2 %v4105_v25 }
 0x572   :  { %1756 = vmatmul.bf16.gmra.mxu2 %v4108_v27 }
 0x582   :  { %1761 = vmatmul.bf16.gmra.mxu2 %v4111_v32 }
 0x592   :  { %1766 = vmatmul.bf16.gmra.mxu2 %v4114_v36 }
 0x5a5   :  { %v1732_v25 = vpop.f32.mrf.mxu2 }
 0x5ad   :  { %v1734_v27 = vpop.f32.mrf.mxu2 }
 0x5ae   :  { %v1772_v46 = vpack.c.bf16 %v1734_v27, %v1732_v25 }
 0x5b0   :  { %1856 = vmatmul.bf16.vlgmr.msra.gmra.mxu3 %v1772_v46 }
 0x5b5   :  { %v1737_v47 = vpop.f32.mrf.mxu2 }
 0x5bd   :  { %v1739_v60 = vpop.f32.mrf.mxu2 }
 0x5be   :  { %v1773_v61 = vpack.c.bf16 %v1739_v60, %v1737_v47 }
 0x5c0   :  { %1861 = vmatmul.bf16.gmra.mxu3 %v1773_v61 }
 0x5c5   :  { %v1742_v62 = vpop.f32.mrf.mxu2 }
 0x5cd   :  { %v1744_v11 = vpop.f32.mrf.mxu2 }
 0x5ce   :  { %v1774_v2 = vpack.c.bf16 %v1744_v11, %v1742_v62 }
 0x5d0   :  { %1866 = vmatmul.bf16.gmra.mxu3 %v1774_v2 }
 0x5d5   :  { %v1747_v32 = vpop.f32.mrf.mxu2 }
 0x5dd   :  { %v1749_v12 = vpop.f32.mrf.mxu2 }
 0x5de   :  { %v1775_v0 = vpack.c.bf16 %v1749_v12, %v1747_v32 }
 0x5e0   :  { %1871 = vmatmul.bf16.gmra.mxu3 %v1775_v0 }
 0x5e5   :  { %v1752_v13 = vpop.f32.mrf.mxu2 }
 0x5ed   :  { %v1754_v15 = vpop.f32.mrf.mxu2 }
 0x5ee   :  { %v1776_v16 = vpack.c.bf16 %v1754_v15, %v1752_v13 }
 0x5f0   :  { %1876 = vmatmul.bf16.gmra.mxu3 %v1776_v16 }
 0x5f5   :  { %v1757_v36 = vpop.f32.mrf.mxu2 }
 0x5fd   :  { %v1759_v3 = vpop.f32.mrf.mxu2 }
 0x5fe   :  { %v1777_v17 = vpack.c.bf16 %v1759_v3, %v1757_v36 }
 0x600   :  { %1881 = vmatmul.bf16.gmra.mxu3 %v1777_v17 }
 0x605   :  { %v1762_v22 = vpop.f32.mrf.mxu2 }
 0x60d   :  { %v1764_v23 = vpop.f32.mrf.mxu2 }
 0x60e   :  { %v1778_v7 = vpack.c.bf16 %v1764_v23, %v1762_v22 }
 0x610   :  { %1886 = vmatmul.bf16.gmra.mxu3 %v1778_v7 }
 0x615   :  { %v1767_v28 = vpop.f32.mrf.mxu2 }
 0x61d   :  { %v1769_v30 = vpop.f32.mrf.mxu2 }
 0x61e   :  { %v1779_v33 = vpack.c.bf16 %v1769_v30, %v1767_v28 }
 0x620   :  { %1891 = vmatmul.bf16.gmra.mxu3 %v1779_v33 }
 0x633   :  { %v1857_v38 = vpop.f32.mrf.mxu3 }
 0x634   :  { %v1858_v39 = vadd.f32 %v4213_v37, %v1857_v38 }
 0x636   :  { %v1913_v40 = vmin.f32 %v1858_v39, 0.0  ;;  %vm1897_vm0 = vcmp.gt.f32.partialorder %v1858_v39, 0.0 }
 0x638   :  { %v1929_v41 = vmul.f32 1.442695, %v1913_v40 }
 0x63a   :  { %3468 = vpow2.f32 %v1929_v41 }
 0x63b   :  { %v1859_v42 = vpop.f32.mrf.mxu3 }
 0x63c   :  { %v1860_v43 = vadd.f32 %v4213_v37, %v1859_v42 }
 0x63e   :  { %v1914_v44 = vmin.f32 %v1860_v43, 0.0  ;;  %vm1898_vm1 = vcmp.gt.f32.partialorder %v1860_v43, 0.0 }
 0x640   :  { %v1931_v48 = vmul.f32 1.442695, %v1914_v44  ;;  %v3469_v52 = vpop.eup %3468 }
 0x641   :  { %v2920_v55 = vadd.f32 -1.0, %v3469_v52 }
 0x642   :  { %3470 = vpow2.f32 %v1931_v48 }
 0x643   :  { %v1862_v51 = vpop.f32.mrf.mxu3  ;;  %v1977_v1 = vsel %vm1897_vm0, %v1858_v39, %v2920_v55 }
 0x644   :  { %v1863_v53 = vadd.f32 %v4213_v37, %v1862_v51 }
 0x646   :  { %v1915_v54 = vmin.f32 %v1863_v53, 0.0  ;;  %vm1899_vm2 = vcmp.gt.f32.partialorder %v1863_v53, 0.0 }
 0x648   :  { %v3471_v59 = vpop.eup %3470  ;;  %v1933_v8 = vmul.f32 1.442695, %v1915_v54 }
 0x649   :  { %v2921_v50 = vadd.f32 -1.0, %v3471_v59 }
 0x64a   :  { %3472 = vpow2.f32 %v1933_v8 }
 0x64b   :  { %v1978_v49 = vsel %vm1898_vm1, %v1860_v43, %v2921_v50  ;;  %v1864_v5 = vpop.f32.mrf.mxu3 }
 0x64c   :  { %v1993_v6 = vpack.c.bf16 %v1978_v49, %v1977_v1  ;;  %v1865_v4 = vadd.f32 %v4213_v37, %v1864_v5 }
 0x64e   :  { %v1916_v63 = vmin.f32 %v1865_v4, 0.0  ;;  %2077 = vmatmul.bf16.vlgmr.msra.gmra.mxu0 %v1993_v6  ;;  %vm1900_vm3 = vcmp.gt.f32.partialorder %v1865_v4, 0.0 }
 0x650   :  { %v1935_v9 = vmul.f32 1.442695, %v1916_v63  ;;  %v3473_v18 = vpop.eup %3472 }
 0x651   :  { %v2922_v57 = vadd.f32 -1.0, %v3473_v18 }
 0x652   :  { %3474 = vpow2.f32 %v1935_v9 }
 0x653   :  { %v1867_v45 = vpop.f32.mrf.mxu3  ;;  %v1979_v27 = vsel %vm1899_vm2, %v1863_v53, %v2922_v57 }
 0x654   :  { %v1868_v19 = vadd.f32 %v4213_v37, %v1867_v45 }
 0x656   :  { %v1917_v56 = vmin.f32 %v1868_v19, 0.0  ;;  %vm1901_vm4 = vcmp.gt.f32.partialorder %v1868_v19, 0.0 }
 0x658   :  { %v3475_v58 = vpop.eup %3474  ;;  %v1937_v24 = vmul.f32 1.442695, %v1917_v56 }
 0x659   :  { %v2923_v20 = vadd.f32 -1.0, %v3475_v58 }
 0x65a   :  { %3476 = vpow2.f32 %v1937_v24 }
 0x65b   :  { %v1869_v25 = vpop.f32.mrf.mxu3  ;;  %v1980_v46 = vsel %vm1900_vm3, %v1865_v4, %v2923_v20 }
 0x65c   :  { %v1870_v47 = vadd.f32 %v4213_v37, %v1869_v25  ;;  %v1994_v60 = vpack.c.bf16 %v1980_v46, %v1979_v27 }
 0x65e   :  { %v1918_v61 = vmin.f32 %v1870_v47, 0.0  ;;  %2082 = vmatmul.bf16.gmra.mxu0 %v1994_v60  ;;  %vm1902_vm5 = vcmp.gt.f32.partialorder %v1870_v47, 0.0 }
 0x660   :  { %v1939_v62 = vmul.f32 1.442695, %v1918_v61  ;;  %v3477_v2 = vpop.eup %3476 }
 0x661   :  { %v2924_v0 = vadd.f32 -1.0, %v3477_v2 }
 0x662   :  { %3478 = vpow2.f32 %v1939_v62 }
 0x663   :  { %v1872_v11 = vpop.f32.mrf.mxu3  ;;  %v1981_v3 = vsel %vm1901_vm4, %v1868_v19, %v2924_v0 }
 0x664   :  { %v1873_v32 = vadd.f32 %v4213_v37, %v1872_v11 }
 0x666   :  { %v1919_v12 = vmin.f32 %v1873_v32, 0.0  ;;  %vm1903_vm6 = vcmp.gt.f32.partialorder %v1873_v32, 0.0 }
 0x668   :  { %v3479_v13 = vpop.eup %3478  ;;  %v1941_v16 = vmul.f32 1.442695, %v1919_v12 }
 0x669   :  { %v2925_v15 = vadd.f32 -1.0, %v3479_v13 }
 0x66a   :  { %3480 = vpow2.f32 %v1941_v16 }
 0x66b   :  { %v1874_v36 = vpop.f32.mrf.mxu3  ;;  %v1982_v17 = vsel %vm1902_vm5, %v1870_v47, %v2925_v15 }
 0x66c   :  { %v1875_v21 = vadd.f32 %v4213_v37, %v1874_v36  ;;  %v1995_v22 = vpack.c.bf16 %v1982_v17, %v1981_v3 }
 0x66e   :  { %v1920_v23 = vmin.f32 %v1875_v21, 0.0  ;;  %2087 = vmatmul.bf16.gmra.mxu0 %v1995_v22  ;;  %vm1904_vm7 = vcmp.gt.f32.partialorder %v1875_v21, 0.0 }
 0x670   :  { %v1943_v7 = vmul.f32 1.442695, %v1920_v23  ;;  %v3481_v28 = vpop.eup %3480 }
 0x671   :  { %v2926_v30 = vadd.f32 -1.0, %v3481_v28 }
 0x672   :  { %3482 = vpow2.f32 %v1943_v7 }
 0x673   :  { %v1877_v26 = vpop.f32.mrf.mxu3  ;;  %v1983_v14 = vsel %vm1903_vm6, %v1873_v32, %v2926_v30 }
 0x674   :  { %v1878_v29 = vadd.f32 %v4213_v37, %v1877_v26 }
 0x676   :  { %v1921_v10 = vmin.f32 %v1878_v29, 0.0  ;;  %vm1905_vm8 = vcmp.gt.f32.partialorder %v1878_v29, 0.0 }
 0x678   :  { %v3483_v31 = vpop.eup %3482  ;;  %v1945_v34 = vmul.f32 1.442695, %v1921_v10 }
 0x679   :  { %v2927_v33 = vadd.f32 -1.0, %v3483_v31 }
 0x67a   :  { %3484 = vpow2.f32 %v1945_v34 }
 0x67b   :  { %v1879_v35 = vpop.f32.mrf.mxu3  ;;  %v1984_v38 = vsel %vm1904_vm7, %v1875_v21, %v2927_v33 }
 0x67c   :  { %v1880_v39 = vadd.f32 %v4213_v37, %v1879_v35  ;;  %v1996_v40 = vpack.c.bf16 %v1984_v38, %v1983_v14 }
 0x67e   :  { %v1922_v41 = vmin.f32 %v1880_v39, 0.0  ;;  %2092 = vmatmul.bf16.gmra.mxu0 %v1996_v40  ;;  %vm1906_vm9 = vcmp.gt.f32.partialorder %v1880_v39, 0.0 }
 0x680   :  { %v1947_v42 = vmul.f32 1.442695, %v1922_v41  ;;  %v3485_v44 = vpop.eup %3484 }
 0x681   :  { %v2928_v52 = vadd.f32 -1.0, %v3485_v44 }
 0x682   :  { %3486 = vpow2.f32 %v1947_v42 }
 0x683   :  { %v1882_v43 = vpop.f32.mrf.mxu3  ;;  %v1985_v50 = vsel %vm1905_vm8, %v1878_v29, %v2928_v52 }
 0x684   :  { %v1883_v48 = vadd.f32 %v4213_v37, %v1882_v43 }
 0x686   :  { %v1923_v51 = vmin.f32 %v1883_v48, 0.0  ;;  %vm1907_vm10 = vcmp.gt.f32.partialorder %v1883_v48, 0.0 }
 0x688   :  { %v3487_v53 = vpop.eup %3486  ;;  %v1949_v55 = vmul.f32 1.442695, %v1923_v51 }
 0x689   :  { %v2929_v54 = vadd.f32 -1.0, %v3487_v53 }
 0x68a   :  { %3488 = vpow2.f32 %v1949_v55 }
 0x68b   :  { %v1884_v59 = vpop.f32.mrf.mxu3  ;;  %v1986_v8 = vsel %vm1906_vm9, %v1880_v39, %v2929_v54 }
 0x68c   :  { %v1885_v1 = vadd.f32 %v4213_v37, %v1884_v59  ;;  %v1997_v49 = vpack.c.bf16 %v1986_v8, %v1985_v50 }
 0x68e   :  { %v1924_v5 = vmin.f32 %v1885_v1, 0.0  ;;  %2097 = vmatmul.bf16.gmra.mxu0 %v1997_v49  ;;  %vm1908_vm11 = vcmp.gt.f32.partialorder %v1885_v1, 0.0 }
 0x690   :  { %v1951_v6 = vmul.f32 1.442695, %v1924_v5  ;;  %v3489_v63 = vpop.eup %3488 }
 0x691   :  { %v2930_v18 = vadd.f32 -1.0, %v3489_v63 }
 0x692   :  { %3490 = vpow2.f32 %v1951_v6 }
 0x693   :  { %v1887_v4 = vpop.f32.mrf.mxu3  ;;  %v1987_v20 = vsel %vm1907_vm10, %v1883_v48, %v2930_v18 }
 0x694   :  { %v1888_v9 = vadd.f32 %v4213_v37, %v1887_v4 }
 0x696   :  { %v1925_v45 = vmin.f32 %v1888_v9, 0.0  ;;  %vm1909_vm12 = vcmp.gt.f32.partialorder %v1888_v9, 0.0 }
 0x698   :  { %v3491_v19 = vpop.eup %3490  ;;  %v1953_v57 = vmul.f32 1.442695, %v1925_v45 }
 0x699   :  { %v2931_v56 = vadd.f32 -1.0, %v3491_v19 }
 0x69a   :  { %3492 = vpow2.f32 %v1953_v57 }
 0x69b   :  { %v1889_v58 = vpop.f32.mrf.mxu3  ;;  %v1988_v24 = vsel %vm1908_vm11, %v1885_v1, %v2931_v56 }
 0x69c   :  { %v1890_v25 = vadd.f32 %v4213_v37, %v1889_v58  ;;  %v1998_v27 = vpack.c.bf16 %v1988_v24, %v1987_v20 }
 0x69e   :  { %v1926_v46 = vmin.f32 %v1890_v25, 0.0  ;;  %2102 = vmatmul.bf16.gmra.mxu0 %v1998_v27  ;;  %vm1910_vm13 = vcmp.gt.f32.partialorder %v1890_v25, 0.0 }
 0x6a0   :  { %v1955_v47 = vmul.f32 1.442695, %v1926_v46  ;;  %v3493_v61 = vpop.eup %3492 }
 0x6a1   :  { %v2932_v2 = vadd.f32 -1.0, %v3493_v61 }
 0x6a2   :  { %3494 = vpow2.f32 %v1955_v47 }
 0x6a3   :  { %v1892_v60 = vpop.f32.mrf.mxu3  ;;  %v1989_v15 = vsel %vm1909_vm12, %v1888_v9, %v2932_v2 }
 0x6a4   :  { %v1893_v62 = vadd.f32 %v4213_v37, %v1892_v60 }
 0x6a6   :  { %v1927_v11 = vmin.f32 %v1893_v62, 0.0  ;;  %vm1911_vm14 = vcmp.gt.f32.partialorder %v1893_v62, 0.0 }
 0x6a8   :  { %v3495_v32 = vpop.eup %3494  ;;  %v1957_v0 = vmul.f32 1.442695, %v1927_v11 }
 0x6a9   :  { %v2933_v12 = vadd.f32 -1.0, %v3495_v32 }
 0x6aa   :  { %3496 = vpow2.f32 %v1957_v0 }
 0x6ab   :  { %v1894_v13 = vpop.f32.mrf.mxu3  ;;  %v1990_v16 = vsel %vm1910_vm13, %v1890_v25, %v2933_v12 }
 0x6ac   :  { %v1895_v36 = vadd.f32 %v4213_v37, %v1894_v13  ;;  %v1999_v3 = vpack.c.bf16 %v1990_v16, %v1989_v15  ;;  %v4234_v37 = vld [vmem:[%s4319_s14] ss:$0 sm:$0xff] }
 0x6ae   :  { %v1928_v17 = vmin.f32 %v1895_v36, 0.0  ;;  %2107 = vmatmul.bf16.gmra.mxu0 %v1999_v3  ;;  %vm1912_vm15 = vcmp.gt.f32.partialorder %v1895_v36, 0.0 }
 0x6b0   :  { %v1959_v21 = vmul.f32 1.442695, %v1928_v17  ;;  %v3497_v22 = vpop.eup %3496 }
 0x6b1   :  { %v2934_v23 = vadd.f32 -1.0, %v3497_v22 }
 0x6b2   :  { %3498 = vpow2.f32 %v1959_v21 }
 0x6b3   :  { %v1991_v28 = vsel %vm1911_vm14, %v1893_v62, %v2934_v23 }
 0x6b8   :  { %v3499_v7 = vpop.eup %3498 }
 0x6b9   :  { %v2935_v26 = vadd.f32 -1.0, %v3499_v7 }
 0x6bb   :  { %v1992_v29 = vsel %vm1912_vm15, %v1895_v36, %v2935_v26 }
 0x6bc   :  { %v2000_v10 = vpack.c.bf16 %v1992_v29, %v1991_v28 }
 0x6be   :  { %2112 = vmatmul.bf16.gmra.mxu0 %v2000_v10 }
 0x6cb   :  { %v2078_v30 = vpop.f32.mrf.mxu0 }
 0x6cc   :  { %v2079_v31 = vadd.f32 %v4234_v37, %v2078_v30 }
 0x6ce   :  { %v2134_v33 = vmin.f32 %v2079_v31, 0.0  ;;  %vm2118_vm0 = vcmp.gt.f32.partialorder %v2079_v31, 0.0 }
 0x6d0   :  { %v2150_v34 = vmul.f32 1.442695, %v2134_v33 }
 0x6d2   :  { %3500 = vpow2.f32 %v2150_v34 }
 0x6d3   :  { %v2080_v35 = vpop.f32.mrf.mxu0 }
 0x6d4   :  { %v2081_v14 = vadd.f32 %v4234_v37, %v2080_v35 }
 0x6d6   :  { %v2135_v38 = vmin.f32 %v2081_v14, 0.0  ;;  %vm2119_vm1 = vcmp.gt.f32.partialorder %v2081_v14, 0.0 }
 0x6d8   :  { %v2152_v39 = vmul.f32 1.442695, %v2135_v38  ;;  %v3501_v41 = vpop.eup %3500 }
 0x6d9   :  { %v2968_v44 = vadd.f32 -1.0, %v3501_v41 }
 0x6da   :  { %3502 = vpow2.f32 %v2152_v39 }
 0x6db   :  { %v2083_v40 = vpop.f32.mrf.mxu0  ;;  %v4239_v54 = vsel %vm2118_vm0, %v2079_v31, %v2968_v44 }
 0x6dc   :  { %v2084_v42 = vadd.f32 %v4234_v37, %v2083_v40 }
 0x6de   :  { %v2136_v43 = vmin.f32 %v2084_v42, 0.0  ;;  %vm2120_vm2 = vcmp.gt.f32.partialorder %v2084_v42, 0.0 }
 0x6e0   :  { %v3503_v48 = vpop.eup %3502  ;;  %v2154_v52 = vmul.f32 1.442695, %v2136_v43 }
 0x6e1   :  { %v2969_v51 = vadd.f32 -1.0, %v3503_v48 }
 0x6e2   :  { %3504 = vpow2.f32 %v2154_v52 }
 0x6e3   :  { %v2085_v53 = vpop.f32.mrf.mxu0  ;;  %v4241_v55 = vsel %vm2119_vm1, %v2081_v14, %v2969_v51 }
 0x6e4   :  { %v2086_v59 = vadd.f32 %v4234_v37, %v2085_v53  ;;  %v2214_v50 = vpack.c.bf16 %v4241_v55, %v4239_v54  ;;  %v3175_v54 = vld [vmem:[#allocation20 + $0x10] sm:$0xff]  ;;  %v3174_v55 = vld [vmem:[#allocation20 + $0x8] sm:$0xff] }
 0x6e6   :  { %v2137_v8 = vmin.f32 %v2086_v59, 0.0  ;;  %vm2121_vm3 = vcmp.gt.f32.partialorder %v2086_v59, 0.0 }
 0x6e8   :  { %v2156_v1 = vmul.f32 1.442695, %v2137_v8  ;;  %v3505_v5 = vpop.eup %3504 }
 0x6e9   :  { %v2970_v63 = vadd.f32 -1.0, %v3505_v5 }
 0x6ea   :  { %3506 = vpow2.f32 %v2156_v1 }
 0x6eb   :  { %v2088_v49 = vpop.f32.mrf.mxu0  ;;  %v4247_v56 = vsel %vm2120_vm2, %v2084_v42, %v2970_v63 }
 0x6ec   :  { %v2089_v6 = vadd.f32 %v4234_v37, %v2088_v49 }
 0x6ee   :  { %v2138_v4 = vmin.f32 %v2089_v6, 0.0  ;;  %vm2122_vm4 = vcmp.gt.f32.partialorder %v2089_v6, 0.0 }
 0x6f0   :  { %v3507_v9 = vpop.eup %3506  ;;  %v2158_v18 = vmul.f32 1.442695, %v2138_v4 }
 0x6f1   :  { %v2971_v45 = vadd.f32 -1.0, %v3507_v9 }
 0x6f2   :  { %3508 = vpow2.f32 %v2158_v18 }
 0x6f3   :  { %v2090_v19 = vpop.f32.mrf.mxu0  ;;  %v4249_v57 = vsel %vm2121_vm3, %v2086_v59, %v2971_v45 }
 0x6f4   :  { %v2091_v58 = vadd.f32 %v4234_v37, %v2090_v19  ;;  %v2215_v20 = vpack.c.bf16 %v4249_v57, %v4247_v56 }
 0x6f6   :  { %v2139_v24 = vmin.f32 %v2091_v58, 0.0  ;;  %vm2123_vm5 = vcmp.gt.f32.partialorder %v2091_v58, 0.0 }
 0x6f8   :  { %v2160_v25 = vmul.f32 1.442695, %v2139_v24  ;;  %v3509_v46 = vpop.eup %3508 }
 0x6f9   :  { %v2972_v61 = vadd.f32 -1.0, %v3509_v46 }
 0x6fa   :  { %3510 = vpow2.f32 %v2160_v25 }
 0x6fb   :  { %v2093_v27 = vpop.f32.mrf.mxu0  ;;  %v4255_v12 = vsel %vm2122_vm4, %v2089_v6, %v2972_v61 }
 0x6fc   :  { %v2094_v47 = vadd.f32 %v4234_v37, %v2093_v27 }
 0x6fe   :  { %v2140_v60 = vmin.f32 %v2094_v47, 0.0  ;;  %vm2124_vm6 = vcmp.gt.f32.partialorder %v2094_v47, 0.0 }
 0x700   :  { %v3511_v62 = vpop.eup %3510  ;;  %v2162_v2 = vmul.f32 1.442695, %v2140_v60 }
 0x701   :  { %v2973_v11 = vadd.f32 -1.0, %v3511_v62 }
 0x702   :  { %3512 = vpow2.f32 %v2162_v2 }
 0x703   :  { %v2095_v32 = vpop.f32.mrf.mxu0  ;;  %v4257_v0 = vsel %vm2123_vm5, %v2091_v58, %v2973_v11 }
 0x704   :  { %v2096_v13 = vadd.f32 %v4234_v37, %v2095_v32  ;;  %v2216_v15 = vpack.c.bf16 %v4257_v0, %v4255_v12  ;;  %v3178_v12 = vld [vmem:[#allocation20 + $0x28] sm:$0xff]  ;;  %v3177_v0 = vld [vmem:[#allocation20 + $0x20] sm:$0xff] }
 0x706   :  { %v2141_v16 = vmin.f32 %v2096_v13, 0.0  ;;  %vm2125_vm7 = vcmp.gt.f32.partialorder %v2096_v13, 0.0 }
 0x708   :  { %v2164_v36 = vmul.f32 1.442695, %v2141_v16  ;;  %v3513_v17 = vpop.eup %3512 }
 0x709   :  { %v2974_v21 = vadd.f32 -1.0, %v3513_v17 }
 0x70a   :  { %3514 = vpow2.f32 %v2164_v36  ;;  %v3172_v36 = vld [vmem:[#allocation19 + $0x38] sm:$0xff] }
 0x70b   :  { %v2098_v3 = vpop.f32.mrf.mxu0  ;;  %v4262_v26 = vsel %vm2124_vm6, %v2094_v47, %v2974_v21  ;;  %2305 = vmatpush.bf16.msrb.mxu2 %v3172_v36 }
 0x70c   :  { %v2099_v1 = vadd.f32 %v4234_v37, %v2098_v3 }
 0x70e   :  { %v2142_v9 = vmin.f32 %v2099_v1, 0.0  ;;  %vm2126_vm15 = vcmp.gt.f32.partialorder %v2099_v1, 0.0 }
 0x710   :  { %v3515_v22 = vpop.eup %3514  ;;  %v2166_v24 = vmul.f32 1.442695, %v2142_v9 }
 0x711   :  { %v2975_v23 = vadd.f32 -1.0, %v3515_v22  ;;  %v3171_v22 = vld [vmem:[#allocation19 + $0x30] sm:$0xff] }
 0x712   :  { %2306 = vmatpush.bf16.msrb.mxu2 %v3171_v22 }
 0x713   :  { %v2100_v7 = vpop.f32.mrf.mxu0  ;;  %v4264_v28 = vsel %vm2125_vm7, %v2096_v13, %v2975_v23 }
 0x714   :  { %v2217_v29 = vpack.c.bf16 %v4264_v28, %v4262_v26  ;;  %v4274_v51 = vadd.f32 %v4234_v37, %v2100_v7  ;;  %v3165_v26 = vld [vmem:[#allocation19] sm:$0xff]  ;;  %v3180_v28 = vld [vmem:[#allocation20 + $0x38] sm:$0xff] }
 0x715   :  { %2393 = vmatpush.bf16.msrb.mxu3 %v3180_v28 }
 0x716   :  { %v2143_v6 = vmin.f32 %v4274_v51, 0.0  ;;  %vm2127_vm14 = vcmp.gt.f32.partialorder %v4274_v51, 0.0 }
 0x718   :  { %v2168_v19 = vmul.f32 1.442695, %v2143_v6 }
 0x71b   :  { %v2103_v10 = vpop.f32.mrf.mxu0 }
 0x71c   :  { %v2104_v43 = vadd.f32 %v4234_v37, %v2103_v10 }
 0x71e   :  { %v2144_v49 = vmin.f32 %v2104_v43, 0.0  ;;  %vm2128_vm13 = vcmp.gt.f32.partialorder %v2104_v43, 0.0 }
 0x720   :  { %v2170_v45 = vmul.f32 1.442695, %v2144_v49 }
 0x723   :  { %v2105_v30 = vpop.f32.mrf.mxu0 }
 0x724   :  { %v2106_v40 = vadd.f32 %v4234_v37, %v2105_v30 }
 0x726   :  { %v2145_v52 = vmin.f32 %v2106_v40, 0.0  ;;  %vm2129_vm12 = vcmp.gt.f32.partialorder %v2106_v40, 0.0 }
 0x728   :  { %v2172_v4 = vmul.f32 1.442695, %v2145_v52  ;;  %v3186_v52 = vld [vmem:[#allocation22 + $0x28] sm:$0xff] }
 0x72b   :  { %v2108_v31 = vpop.f32.mrf.mxu0 }
 0x72c   :  { %v2109_v38 = vadd.f32 %v4234_v37, %v2108_v31 }
 0x72e   :  { %v2146_v42 = vmin.f32 %v2109_v38, 0.0  ;;  %vm2130_vm11 = vcmp.gt.f32.partialorder %v2109_v38, 0.0 }
 0x730   :  { %v2174_v8 = vmul.f32 1.442695, %v2146_v42  ;;  %v3167_v42 = vld [vmem:[#allocation19 + $0x10] sm:$0xff] }
 0x733   :  { %v2110_v33 = vpop.f32.mrf.mxu0 }
 0x734   :  { %v2111_v35 = vadd.f32 %v4234_v37, %v2110_v33 }
 0x736   :  { %v2147_v41 = vmin.f32 %v2111_v35, 0.0  ;;  %vm2131_vm10 = vcmp.gt.f32.partialorder %v2111_v35, 0.0 }
 0x738   :  { %v2176_v53 = vmul.f32 1.442695, %v2147_v41 }
 0x73b   :  { %v2113_v34 = vpop.f32.mrf.mxu0 }
 0x73c   :  { %v2114_v14 = vadd.f32 %v4234_v37, %v2113_v34  ;;  %v3170_v34 = vld [vmem:[#allocation19 + $0x28] sm:$0xff] }
 0x73d   :  { %2307 = vmatpush.bf16.msrb.mxu2 %v3170_v34 }
 0x73e   :  { %v2148_v39 = vmin.f32 %v2114_v14, 0.0  ;;  %vm2132_vm8 = vcmp.gt.f32.partialorder %v2114_v14, 0.0 }
 0x740   :  { %v2178_v44 = vmul.f32 1.442695, %v2148_v39  ;;  %v3169_v39 = vld [vmem:[#allocation19 + $0x20] sm:$0xff] }
 0x741   :  { %2308 = vmatpush.bf16.msrb.mxu2 %v3169_v39 }
 0x742   :  { %3516 = vpow2.f32 %v2178_v44  ;;  %v2222_v44 = vld [vmem:[#allocation5] sm:$0xf] }
 0x743   :  { %v2115_v48 = vpop.f32.mrf.mxu0  ;;  %3518 = vpow2.f32 %v2176_v53  ;;  %v3273_v53 = vld [vmem:[%s4321_s16] ss:$0 sm:$0xff] }
 0x744   :  { %v2116_v59 = vadd.f32 %v4234_v37, %v2115_v48  ;;  %3520 = vpow2.f32 %v2174_v8  ;;  %v3188_v48 = vld [vmem:[#allocation22 + $0x38] sm:$0xff] }
 0x746   :  { %v2149_v5 = vmin.f32 %v2116_v59, 0.0  ;;  %vm2133_vm9 = vcmp.gt.f32.partialorder %v2116_v59, 0.0 }
 0x748   :  { %v2180_v63 = vmul.f32 1.442695, %v2149_v5  ;;  %v3517_v18 = vpop.eup %3516 }
 0x749   :  { %v3519_v58 = vpop.eup %3518  ;;  %v2982_v37 = vadd.f32 -1.0, %v3517_v18  ;;  %v3184_v18 = vld [vmem:[#allocation22 + $0x18] sm:$0xff] }
 0x74a   :  { %3522 = vpow2.f32 %v2180_v63  ;;  %v3521_v25 = vpop.eup %3520  ;;  %v2981_v46 = vadd.f32 -1.0, %v3519_v58  ;;  %v3182_v58 = vld [vmem:[#allocation22 + $0x8] sm:$0xff] }
 0x74b   :  { %3524 = vpow2.f32 %v2172_v4  ;;  %v2980_v61 = vadd.f32 -1.0, %v3521_v25  ;;  %v2212_v62 = vsel %vm2132_vm8, %v2114_v14, %v2982_v37  ;;  %v3274_v25 = vld [vmem:[%s4323_s18] ss:$0 sm:$0xff]  ;;  %s3883_s18 = smov [#allocation23]  }
 0x74c   :  { %3526 = vpow2.f32 %v2170_v45  ;;  %v2211_v16 = vsel %vm2131_vm10, %v2111_v35, %v2981_v46  ;;  %v3185_v45 = vld [vmem:[#allocation22 + $0x20] sm:$0xff]  ;;  %s2506_s9 = sshll.u32 %s3883_s18, 4  ;;  %s2507_s9 = int_to_ptr.vmem [resolvable:$true] %s2506_s9 }
 0x74d   :  { %3528 = vpow2.f32 %v2168_v19  ;;  %v2210_v21 = vsel %vm2130_vm11, %v2109_v38, %v2980_v61  ;;  %v3183_v19 = vld [vmem:[#allocation22 + $0x10] sm:$0xff] }
 0x74e   :  { %3530 = vpow2.f32 %v2166_v24  ;;  %v2220_v7 = vpack.c.bf16 %v2211_v16, %v2210_v21  ;;  %v3181_v24 = vld [vmem:[#allocation22] sm:$0xff] }
 0x750   :  { %v3523_v27 = vpop.eup %3522 }
 0x751   :  { %v2983_v47 = vadd.f32 -1.0, %v3523_v27  ;;  %v3525_v60 = vpop.eup %3524 }
 0x752   :  { %v3527_v2 = vpop.eup %3526  ;;  %v2979_v13 = vadd.f32 -1.0, %v3525_v60 }
 0x753   :  { %v2213_v11 = vsel %vm2133_vm9, %v2116_v59, %v2983_v47  ;;  %v3529_v3 = vpop.eup %3528  ;;  %v2978_v17 = vadd.f32 -1.0, %v3527_v2 }
 0x754   :  { %v2221_v32 = vpack.c.bf16 %v2213_v11, %v2212_v62  ;;  %v3531_v23 = vpop.eup %3530  ;;  %v2977_v10 = vadd.f32 -1.0, %v3529_v3  ;;  %v2209_v30 = vsel %vm2129_vm12, %v2106_v40, %v2979_v13  ;;  %v3168_v40 = vld [vmem:[#allocation19 + $0x18] sm:$0xff] }
 0x755   :  { %v2976_v31 = vadd.f32 -1.0, %v3531_v23  ;;  %v2208_v33 = vsel %vm2128_vm13, %v2104_v43, %v2978_v17  ;;  %2309 = vmatpush.bf16.msrb.mxu2 %v3168_v40  ;;  %v3166_v43 = vld [vmem:[#allocation19 + $0x8] sm:$0xff] }
 0x756   :  { %2223 = vmatpush.bf16.msra.mxu1 %v2221_v32  ;;  %v2219_v35 = vpack.c.bf16 %v2209_v30, %v2208_v33  ;;  %v2207_v14 = vsel %vm2127_vm14, %v4274_v51, %v2977_v10  ;;  %v3187_v51 = vld [vmem:[#allocation22 + $0x30] sm:$0xff]  ;;  %v3275_v32 = vld [vmem:[%s4325_s20] ss:$0 sm:$0xff] }
 0x757   :  { %v2206_v38 = vsel %vm2126_vm15, %v2099_v1, %v2976_v31 }
 0x758   :  { %v2218_v41 = vpack.c.bf16 %v2207_v14, %v2206_v38 }
 0x759   :  { %2310 = vmatpush.bf16.msrb.mxu2 %v3167_v42 }
 0x75a   :  { %2224 = vmatpush.bf16.msra.mxu1 %v2220_v7 }
 0x75d   :  { %2311 = vmatpush.bf16.msrb.mxu2 %v3166_v43 }
 0x75e   :  { %2225 = vmatpush.bf16.msra.mxu1 %v2219_v35 }
 0x761   :  { %2312 = vmatpush.bf16.msrb.mxu2 %v3165_v26 }
 0x762   :  { %2226 = vmatpush.bf16.msra.mxu1 %v2218_v41 }
 0x766   :  { %2227 = vmatpush.bf16.msra.mxu1 %v2217_v29  ;;  %v3179_v29 = vld [vmem:[#allocation20 + $0x30] sm:$0xff] }
 0x767   :  { %2394 = vmatpush.bf16.msrb.mxu3 %v3179_v29 }
 0x76a   :  { %2228 = vmatpush.bf16.msra.mxu1 %v2216_v15  ;;  %v3176_v15 = vld [vmem:[#allocation20 + $0x18] sm:$0xff] }
 0x76b   :  { %2395 = vmatpush.bf16.msrb.mxu3 %v3178_v12 }
 0x76e   :  { %2229 = vmatpush.bf16.msra.mxu1 %v2215_v20 }
 0x76f   :  { %2396 = vmatpush.bf16.msrb.mxu3 %v3177_v0 }
 0x772   :  { %2230 = vmatpush.bf16.msra.mxu1 %v2214_v50  ;;  %v3173_v50 = vld [vmem:[#allocation20] sm:$0xff] }
 0x773   :  { %2397 = vmatpush.bf16.msrb.mxu3 %v3176_v15 }
 0x775   :  { %2231 = vmatmul.bf16.vlgmr.msra.gmra.mxu1 %v2222_v44 }
 0x776   :  { %2481 = vmatpush.bf16.msrb.mxu1 %v3188_v48 }
 0x777   :  { %2398 = vmatpush.bf16.msrb.mxu3 %v3175_v54 }
 0x77a   :  { %2482 = vmatpush.bf16.msrb.mxu1 %v3187_v51 }
 0x77b   :  { %2399 = vmatpush.bf16.msrb.mxu3 %v3174_v55 }
 0x77e   :  { %2483 = vmatpush.bf16.msrb.mxu1 %v3186_v52 }
 0x77f   :  { %2400 = vmatpush.bf16.msrb.mxu3 %v3173_v50 }
 0x782   :  { %2484 = vmatpush.bf16.msrb.mxu1 %v3185_v45 }
 0x786   :  { %2485 = vmatpush.bf16.msrb.mxu1 %v3184_v18 }
 0x78a   :  { %2486 = vmatpush.bf16.msrb.mxu1 %v3183_v19 }
 0x78e   :  { %2487 = vmatpush.bf16.msrb.mxu1 %v3182_v58 }
 0x792   :  { %2488 = vmatpush.bf16.msrb.mxu1 %v3181_v24 }
 0x7f2   :  { %v2232_v56 = vpop.f32.mrf.mxu1 }
 0x7f3   :  { %v2236_v57 = vpack.c.bf16 %v2232_v56, %v2232_v56 }
 0x7f5   :  { %2313 = vmatmul.bf16.vlgmr.msrb.gmra.mxu2 %v2236_v57 }
 0x7fa   :  { %v2234_v20 = vpop.f32.mrf.mxu1 }
 0x878   :  { %v2314_v59 = vpop.f32.mrf.mxu2 }
 0x879   :  { %v2315_v8 = vadd.f32 %v3273_v53, %v2314_v59 }
 0x87b   :  { %v2319_v1 = vmin.f32 %v2315_v8, 0.0  ;;  %vm2318_vm0 = vcmp.gt.f32.partialorder %v2315_v8, 0.0 }
 0x87d   :  { %v2320_v49 = vmul.f32 1.442695, %v2319_v1 }
 0x87f   :  { %3532 = vpow2.f32 %v2320_v49 }
 0x880   :  { %v2316_v5 = vpop.f32.mrf.mxu2 }
 0x885   :  { %v3533_v6 = vpop.eup %3532 }
 0x886   :  { %v3016_v4 = vadd.f32 -1.0, %v3533_v6 }
 0x888   :  { %v2323_v63 = vsel %vm2318_vm0, %v2315_v8, %v3016_v4 }
 0x889   :  { %v2324_v9 = vpack.c.bf16 %v2323_v63, %v2323_v63 }
 0x88b   :  { %2401 = vmatmul.bf16.vlgmr.msrb.gmra.mxu3 %v2324_v9 }
 0x90e   :  { %v2402_v37 = vpop.f32.mrf.mxu3 }
 0x90f   :  { %v2403_v27 = vadd.f32 %v3274_v25, %v2402_v37 }
 0x911   :  { %v2407_v46 = vmin.f32 %v2403_v27, 0.0  ;;  %vm2406_vm1 = vcmp.gt.f32.partialorder %v2403_v27, 0.0 }
 0x913   :  { %v2408_v47 = vmul.f32 1.442695, %v2407_v46 }
 0x915   :  { %3534 = vpow2.f32 %v2408_v47 }
 0x916   :  { %v2404_v60 = vpop.f32.mrf.mxu3 }
 0x91b   :  { %v3535_v61 = vpop.eup %3534 }
 0x91c   :  { %v3049_v62 = vadd.f32 -1.0, %v3535_v61 }
 0x91e   :  { %v2411_v11 = vsel %vm2406_vm1, %v2403_v27, %v3049_v62 }
 0x91f   :  { %v2412_v2 = vpack.c.bf16 %v2411_v11, %v2411_v11 }
 0x921   :  { %2489 = vmatmul.bf16.vlgmr.msrb.gmra.mxu1 %v2412_v2 }
 0x99e   :  { %v2490_v13 = vpop.f32.mrf.mxu1 }
 0x99f   :  { %v2491_v16 = vadd.f32 %v3275_v32, %v2490_v13 }
 0x9a1   :  { %v2495_v36 = vmin.f32 %v2491_v16, 0.0  ;;  %vm2494_vm2 = vcmp.gt.f32.partialorder %v2491_v16, 0.0 }
 0x9a3   :  { %v2496_v3 = vmul.f32 1.442695, %v2495_v36 }
 0x9a5   :  { %3536 = vpow2.f32 %v2496_v3 }
 0x9a6   :  { %v2492_v17 = vpop.f32.mrf.mxu1 }
 0x9ab   :  { %v3537_v21 = vpop.eup %3536 }
 0x9ac   :  { %v3082_v22 = vadd.f32 -1.0, %v3537_v21 }
 0x9ae   :  { %v2499_v23 = vsel %vm2494_vm2, %v2491_v16, %v3082_v22 }
 0x9af   :  { %2500 = vst [vmem:[#allocation23] sm:$0xff] %v2499_v23 }
 0x9b0   :  { %2511 = dma.vmem_to_hbm [thread:$0]  %s2507_s9, 128, %s2509_s19, [#allocation7]  }
 0x9b1   :  { %3867 = dma.done.wait [#allocation7], 128  }
 0x9b2   :  { %3868 = vsyncadd [#allocation7], 4294967168 }
 0x9b3   :  { %2516 = vsyncpa [#allocation6], 1 }
 0x9b4   :  { %2517 = vsyncpa [#allocation9], 1 }
 0x9b5   :  { %2518 = vsyncpa [#allocation12], 1 }
 0x9b6   :  { %2519 = vsyncpa [#allocation15], 1 }
 0x9b7   :  { %2520 = vsyncpa [#allocation18], 1 }
 0x9b8   :  { %2521 = vsyncpa [#allocation21], 1 }
 0x9b9   :  { %2522 = vsyncpa [#allocation7], 1 }
 0x9ba   :  { %2523 = vsyncmov [#allocation4] }
 0x9bd   :  { %s2524_s20 = vpop.sfrf %2523 }
 0x9be   :  { %p3083_p0 = scmp.ne.s32.totalorder %s2524_s20, 0 }
 0x9c0   :  { %2528 = shalt.err (%p3083_p0)  }
 0x9c1   :  { %2530 = vsyncmov [#allocation4 + $0x1] }
 0x9c4   :  { %s2531_s21 = vpop.sfrf %2530 }
 0x9c5   :  { %p3084_p1 = scmp.ne.s32.totalorder %s2531_s21, 0 }
 0x9c7   :  { %2535 = shalt.err (%p3084_p1)  }

</bundles_post_ra>
